<compile_context>
chip_gen: v5e
topology: v5e:2x2
jax: 0.10.0
libtpu: 0.0.40
codegen_flags: <defaults>
</compile_context>

<pallas_src>
import jax
import jax.numpy as jnp
from jax.experimental import pallas as pl
from jax.experimental.pallas import tpu as pltpu

IN_FEATURES = 28 * 28   # 784
HIDDEN = 512
OUT_FEATURES = 10
OUT_PAD = 128           # lane-dense output width (10 -> 128)


def mlp_kernel(x_ref, w1_ref, b1_ref, w2_ref, b2_ref, w3_ref, b3_ref, o_ref):
    # Three bf16 MXU matmuls with f32 accumulation; bias-add / ReLU epilogue in
    # f32 on the accumulator.  Weights are VMEM-resident across grid steps.
    x = x_ref[...]                                                           # (TB, 784) bf16
    h1 = jnp.dot(x, w1_ref[...], preferred_element_type=jnp.float32) + b1_ref[...]
    h1 = jnp.maximum(h1, 0.0).astype(jnp.bfloat16)
    h2 = jnp.dot(h1, w2_ref[...], preferred_element_type=jnp.float32) + b2_ref[...]
    h2 = jnp.maximum(h2, 0.0).astype(jnp.bfloat16)
    o_ref[...] = jnp.dot(h2, w3_ref[...], preferred_element_type=jnp.float32) + b3_ref[...]


def _round_up(x, m):
    return (x + m - 1) // m * m


def _pick_tile_b(B):
    """Batch-tile size.

    * B < 256 : single grid step; multiples of 16 rows (bf16 sublane packing)
      when B allows, otherwise 8.  Ragged/oversized final block is masked.
    * B >= 256: at least 2 grid steps (so the "parallel" batch axis shards
      across both v7x TensorCores), 128-row multiples for full MXU row blocks,
      capped at 1024 rows (per-step VMEM ~14 MB << 32 MiB scoped limit).
    """
    if B < 256:
        return _round_up(B, 16) if B >= 16 else _round_up(B, 8)
    return min(1024, _round_up(pl.cdiv(B, 2), 128))


def neural_network_forward(x_nchw, params):
    """x_nchw: (B, 1, 28, 28) float32.  Returns logits (B, 10) float32."""
    w1, b1, w2, b2, w3, b3 = params  # bf16 weights, f32 biases (w3/b3 lane-padded)
    B = x_nchw.shape[0]

    # nn.Flatten(): flatten all dims except batch; cast to bf16 for the MXU.
    # NOTE: no feature padding and no materialized padded copy -- the (B, 784)
    # array goes straight into pallas_call.
    x2d = x_nchw.reshape(B, -1).astype(jnp.bfloat16)                         # (B, 784)

    TILE_B = _pick_tile_b(B)
    num_tiles = pl.cdiv(B, TILE_B)
    b_eff = num_tiles * TILE_B

    flops = 2 * b_eff * (IN_FEATURES * HIDDEN + HIDDEN * HIDDEN + HIDDEN * OUT_PAD)
    bytes_accessed = (
        x2d.size * 2                                   # bf16 activations in
        + (w1.size + w2.size + w3.size) * 2            # bf16 weights
        + (b1.size + b2.size + b3.size) * 4            # f32 biases
        + B * OUT_PAD * 4                              # f32 logits out
    )

    out = pl.pallas_call(
        mlp_kernel,
        out_shape=jax.ShapeDtypeStruct((B, OUT_PAD), jnp.float32),
        grid=(num_tiles,),
        in_specs=[
            pl.BlockSpec((TILE_B, IN_FEATURES), lambda i: (i, 0)),   # x tile streams
            pl.BlockSpec((IN_FEATURES, HIDDEN), lambda i: (0, 0)),   # weights pinned
            pl.BlockSpec((1, HIDDEN), lambda i: (0, 0)),
            pl.BlockSpec((HIDDEN, HIDDEN), lambda i: (0, 0)),
            pl.BlockSpec((1, HIDDEN), lambda i: (0, 0)),
            pl.BlockSpec((HIDDEN, OUT_PAD), lambda i: (0, 0)),
            pl.BlockSpec((1, OUT_PAD), lambda i: (0, 0)),
        ],
        out_specs=pl.BlockSpec((TILE_B, OUT_PAD), lambda i: (i, 0)),
        compiler_params=pltpu.CompilerParams(
            dimension_semantics=("parallel",),          # megacore shard on v7x
            vmem_limit_bytes=32 * 1024 * 1024,          # ample for <=1024-row tiles
        ),
        cost_estimate=pl.CostEstimate(
            flops=flops, transcendentals=0, bytes_accessed=bytes_accessed),
    )(x2d, w1, b1, w2, b2, w3, b3)

    # Slice padded logit columns back to the true 10 classes.
    return out[:, :OUT_FEATURES]


def init_params(key):
    """PyTorch-style uniform init; weights stored transposed (in, out).  Only the
    last layer is lane-padded (10 -> 128 output columns).  Weights bf16, biases f32."""
    dims = [
        (IN_FEATURES, HIDDEN, IN_FEATURES, HIDDEN),
        (HIDDEN, HIDDEN, HIDDEN, HIDDEN),
        (HIDDEN, OUT_FEATURES, HIDDEN, OUT_PAD),
    ]
    params = []
    for fan_in, fan_out, pad_in, pad_out in dims:
        key, kw, kb = jax.random.split(key, 3)
        bound = 1.0 / jnp.sqrt(jnp.float32(fan_in))  # PyTorch default uniform bound
        w = jax.random.uniform(kw, (fan_in, fan_out), jnp.float32, -bound, bound)
        b = jax.random.uniform(kb, (1, fan_out), jnp.float32, -bound, bound)
        w_pad = jnp.zeros((pad_in, pad_out), jnp.float32).at[:fan_in, :fan_out].set(w)
        b_pad = jnp.zeros((1, pad_out), jnp.float32).at[:, :fan_out].set(b)
        params.extend([w_pad.astype(jnp.bfloat16), b_pad])
    return tuple(params)


if __name__ == "__main__":
    key = jax.random.PRNGKey(0)
    key, kx = jax.random.split(key)

    B = 8  # small batch (NCHW like PyTorch MNIST)
    x = jax.random.normal(kx, (B, 1, 28, 28), jnp.float32)
    params = init_params(key)

    fwd = jax.jit(neural_network_forward)
    logits = fwd(x, params)
    jax.block_until_ready(logits)

    # Pure-JAX reference of the same (bf16-input, f32-accumulate) math.
    w1, b1, w2, b2, w3, b3 = params
    xf = x.reshape(B, -1).astype(jnp.bfloat16).astype(jnp.float32)
    w1f = w1.astype(jnp.float32)
    w2f = w2.astype(jnp.float32)
    w3f = w3.astype(jnp.float32)[:, :OUT_FEATURES]
    ref = jnp.maximum(xf @ w1f + b1, 0.0)
    ref = ref.astype(jnp.bfloat16).astype(jnp.float32)
    ref = jnp.maximum(ref @ w2f + b2, 0.0)
    ref = ref.astype(jnp.bfloat16).astype(jnp.float32)
    ref = ref @ w3f + b3[:, :OUT_FEATURES]

    assert logits.shape == (B, 10)
    assert jnp.allclose(logits, ref, atol=5e-3, rtol=5e-3)

    print("KERNEL_OK")
</pallas_src>

<mosaic_0001>
module attributes {stable_mosaic.version = 11 : i64} {
  func.func @mlp_kernel(%arg0: i32, %arg1: memref<8x784xbf16, #tpu.memory_space<vmem>>, %arg2: memref<784x512xbf16, #tpu.memory_space<vmem>>, %arg3: memref<1x512xf32, #tpu.memory_space<vmem>>, %arg4: memref<512x512xbf16, #tpu.memory_space<vmem>>, %arg5: memref<1x512xf32, #tpu.memory_space<vmem>>, %arg6: memref<512x128xbf16, #tpu.memory_space<vmem>>, %arg7: memref<1x128xf32, #tpu.memory_space<vmem>>, %arg8: memref<8x128xf32, #tpu.memory_space<vmem>>) attributes {dimension_semantics = [#tpu.dimension_semantics<parallel>], iteration_bounds = array<i64: 1>, scalar_prefetch = 0 : i64, scratch_operands = 0 : i64, tpu.core_type = #tpu.core_type<tc>, window_params = [{transform_indices = @transform_0, window_bounds = array<i64: 8, 784>}, {pipeline_mode = #tpu.pipeline_mode<synchronous>, transform_indices = @transform_1, window_bounds = array<i64: 784, 512>}, {pipeline_mode = #tpu.pipeline_mode<synchronous>, transform_indices = @transform_2, window_bounds = array<i64: 1, 512>}, {pipeline_mode = #tpu.pipeline_mode<synchronous>, transform_indices = @transform_3, window_bounds = array<i64: 512, 512>}, {pipeline_mode = #tpu.pipeline_mode<synchronous>, transform_indices = @transform_4, window_bounds = array<i64: 1, 512>}, {pipeline_mode = #tpu.pipeline_mode<synchronous>, transform_indices = @transform_5, window_bounds = array<i64: 512, 128>}, {pipeline_mode = #tpu.pipeline_mode<synchronous>, transform_indices = @transform_6, window_bounds = array<i64: 1, 128>}, {transform_indices = @transform_7, window_bounds = array<i64: 8, 128>}]} {
    %c0 = arith.constant 0 : index
    %c0_0 = arith.constant 0 : index
    %0 = vector.load %arg1[%c0, %c0_0] : memref<8x784xbf16, #tpu.memory_space<vmem>>, vector<8x784xbf16>
    %c0_1 = arith.constant 0 : index
    %c0_2 = arith.constant 0 : index
    %1 = vector.load %arg2[%c0_1, %c0_2] : memref<784x512xbf16, #tpu.memory_space<vmem>>, vector<784x512xbf16>
    %cst = arith.constant dense<0.000000e+00> : vector<8x512xf32>
    %2 = tpu.matmul %0, %1, %cst {dimension_numbers = #tpu.dot_dimension_numbers<[1], [0], [0], [1], [0, 0, 1, 1], [], []>} : vector<8x784xbf16>, vector<784x512xbf16>, vector<8x512xf32> -> vector<8x512xf32>
    %c0_3 = arith.constant 0 : index
    %c0_4 = arith.constant 0 : index
    %3 = vector.load %arg3[%c0_3, %c0_4] : memref<1x512xf32, #tpu.memory_space<vmem>>, vector<1x512xf32>
    %4 = vector.broadcast %3 : vector<1x512xf32> to vector<8x512xf32>
    %5 = arith.addf %2, %4 : vector<8x512xf32>
    %cst_5 = arith.constant 0.000000e+00 : f32
    %6 = vector.broadcast %cst_5 : f32 to vector<8x512xf32>
    %7 = arith.maximumf %5, %6 : vector<8x512xf32>
    %8 = arith.truncf %7 : vector<8x512xf32> to vector<8x512xbf16>
    %c0_6 = arith.constant 0 : index
    %c0_7 = arith.constant 0 : index
    %9 = vector.load %arg4[%c0_6, %c0_7] : memref<512x512xbf16, #tpu.memory_space<vmem>>, vector<512x512xbf16>
    %cst_8 = arith.constant dense<0.000000e+00> : vector<8x512xf32>
    %10 = tpu.matmul %8, %9, %cst_8 {dimension_numbers = #tpu.dot_dimension_numbers<[1], [0], [0], [1], [0, 0, 1, 1], [], []>} : vector<8x512xbf16>, vector<512x512xbf16>, vector<8x512xf32> -> vector<8x512xf32>
    %c0_9 = arith.constant 0 : index
    %c0_10 = arith.constant 0 : index
    %11 = vector.load %arg5[%c0_9, %c0_10] : memref<1x512xf32, #tpu.memory_space<vmem>>, vector<1x512xf32>
    %12 = vector.broadcast %11 : vector<1x512xf32> to vector<8x512xf32>
    %13 = arith.addf %10, %12 : vector<8x512xf32>
    %cst_11 = arith.constant 0.000000e+00 : f32
    %14 = vector.broadcast %cst_11 : f32 to vector<8x512xf32>
    %15 = arith.maximumf %13, %14 : vector<8x512xf32>
    %16 = arith.truncf %15 : vector<8x512xf32> to vector<8x512xbf16>
    %c0_12 = arith.constant 0 : index
    %c0_13 = arith.constant 0 : index
    %17 = vector.load %arg6[%c0_12, %c0_13] : memref<512x128xbf16, #tpu.memory_space<vmem>>, vector<512x128xbf16>
    %cst_14 = arith.constant dense<0.000000e+00> : vector<8x128xf32>
    %18 = tpu.matmul %16, %17, %cst_14 {dimension_numbers = #tpu.dot_dimension_numbers<[1], [0], [0], [1], [0, 0, 1, 1], [], []>} : vector<8x512xbf16>, vector<512x128xbf16>, vector<8x128xf32> -> vector<8x128xf32>
    %c0_15 = arith.constant 0 : index
    %c0_16 = arith.constant 0 : index
    %19 = vector.load %arg7[%c0_15, %c0_16] : memref<1x128xf32, #tpu.memory_space<vmem>>, vector<1x128xf32>
    %20 = vector.broadcast %19 : vector<1x128xf32> to vector<8x128xf32>
    %21 = arith.addf %18, %20 : vector<8x128xf32>
    %c0_17 = arith.constant 0 : index
    %c0_18 = arith.constant 0 : index
    %22 = vector.load %arg8[%c0_17, %c0_18] : memref<8x128xf32, #tpu.memory_space<vmem>>, vector<8x128xf32>
    tpu.vector_store %arg8[%c0_17, %c0_18], %21 {strides = array<i32>} : memref<8x128xf32, #tpu.memory_space<vmem>>, vector<8x128xf32>,
    return
  }
  func.func @transform_0(%arg0: i32) -> (i32, i32) {
    %c0_i32 = arith.constant 0 : i32
    %c0_i32_0 = arith.constant 0 : i32
    return %arg0, %c0_i32 : i32, i32
  }
  func.func @transform_1(%arg0: i32) -> (i32, i32) {
    %c0_i32 = arith.constant 0 : i32
    %c0_i32_0 = arith.constant 0 : i32
    %c0_i32_1 = arith.constant 0 : i32
    return %c0_i32, %c0_i32_0 : i32, i32
  }
  func.func @transform_2(%arg0: i32) -> (i32, i32) {
    %c0_i32 = arith.constant 0 : i32
    %c0_i32_0 = arith.constant 0 : i32
    %c0_i32_1 = arith.constant 0 : i32
    return %c0_i32, %c0_i32_0 : i32, i32
  }
  func.func @transform_3(%arg0: i32) -> (i32, i32) {
    %c0_i32 = arith.constant 0 : i32
    %c0_i32_0 = arith.constant 0 : i32
    %c0_i32_1 = arith.constant 0 : i32
    return %c0_i32, %c0_i32_0 : i32, i32
  }
  func.func @transform_4(%arg0: i32) -> (i32, i32) {
    %c0_i32 = arith.constant 0 : i32
    %c0_i32_0 = arith.constant 0 : i32
    %c0_i32_1 = arith.constant 0 : i32
    return %c0_i32, %c0_i32_0 : i32, i32
  }
  func.func @transform_5(%arg0: i32) -> (i32, i32) {
    %c0_i32 = arith.constant 0 : i32
    %c0_i32_0 = arith.constant 0 : i32
    %c0_i32_1 = arith.constant 0 : i32
    return %c0_i32, %c0_i32_0 : i32, i32
  }
  func.func @transform_6(%arg0: i32) -> (i32, i32) {
    %c0_i32 = arith.constant 0 : i32
    %c0_i32_0 = arith.constant 0 : i32
    %c0_i32_1 = arith.constant 0 : i32
    return %c0_i32, %c0_i32_0 : i32, i32
  }
  func.func @transform_7(%arg0: i32) -> (i32, i32) {
    %c0_i32 = arith.constant 0 : i32
    %c0_i32_0 = arith.constant 0 : i32
    return %arg0, %c0_i32 : i32, i32
  }
}

</mosaic_0001>

<bundles_post_ra>
// kernel: neural_network_forward.1
= control target key start
LH: loop header
LB: loop body
LE: loop exit
PB: predicated region body
PF: predicated region fallthrough
CT: control target
= control target key end

     0   :  { %12 = vsyncpa [#allocation3], 0  ;;  %s5147_s0 = inlined_call_operand.vmem [shape: bf16[8,784], index: 0, kind: input, shape index: {}]   ;;  %s5148_s1 = inlined_call_operand.hbm [shape: bf16[784,512], index: 1, kind: input, shape index: {}]   ;;  %s5149_s2 = inlined_call_operand.vmem [shape: f32[1,512], index: 2, kind: input, shape index: {}]   ;;  %s5150_s3 = inlined_call_operand.hbm [shape: bf16[512,512], index: 3, kind: input, shape index: {}]   ;;  %s5151_s4 = inlined_call_operand.vmem [shape: f32[1,512], index: 4, kind: input, shape index: {}]   ;;  %s5152_s5 = inlined_call_operand.vmem [shape: bf16[512,128], index: 5, kind: input, shape index: {}]   ;;  %s5153_s6 = inlined_call_operand.vmem [shape: f32[1,128], index: 6, kind: input, shape index: {}]   ;;  %s5154_s7 = inlined_call_operand.hbm [shape: f32[8,128], index: 7, kind: output, shape index: {}]  }
   0x1   :  { %13 = vsyncpa [#allocation6], 0 }
   0x2   :  { %14 = vsyncpa [#allocation4], 0  ;;  %s21_s26 = sshll.u32 %s5148_s1, 4  ;;  %s4843_s27 = smov [#allocation2]   ;;  %s22_s26 = int_to_ptr.hbm [resolvable:$true] %s21_s26 }
   0x3   :  { %s23_s28 = sshll.u32 %s4843_s27, 4  ;;  %s36_s8 = sshll.u32 %s5150_s3, 4  ;;  %s24_s28 = int_to_ptr.vmem [resolvable:$true] %s23_s28  ;;  %s37_s8 = int_to_ptr.hbm [resolvable:$true] %s36_s8 }
   0x4   :  { %s4844_s9 = smov 256   ;;  %s4845_s10 = smov 16  }
   0x5   :  { %29 = dma.hbm_to_vmem [thread:$0]  %s22_s26, 25088, %s24_s28, [#allocation3], %s4844_s9, %s4844_s9, %s4845_s10  }
   0x6   :  { %s4846_s11 = smov [#allocation5]  }
   0x7   :  { %s38_s12 = sshll.u32 %s4846_s11, 4  ;;  %s39_s12 = int_to_ptr.vmem [resolvable:$true] %s38_s12 }
   0x8   :  { %44 = dma.hbm_to_vmem [thread:$0]  %s37_s8, 16384, %s39_s12, [#allocation6], %s4844_s9, %s4844_s9, %s4845_s10  }
   0x9   :  { %4837 = dma.done.wait [#allocation3], 25088  }
   0xa   :  { %4838 = vsyncadd [#allocation3], 4294942208 }
   0xb   :  { %4839 = dma.done.wait [#allocation6], 16384  }
   0xc   :  { %4840 = vsyncadd [#allocation6], 4294950912  ;;  %v3089_v0 = vld [vmem:[#allocation2 + $0xe0] sm:$0xf]  ;;  %v4433_v1 = vld [vmem:[#allocation2 + $0xec] sm:$0xf0] }
   0xd   :  { %v3217_v2 = vld [vmem:[#allocation2 + $0x1e0] sm:$0xf]  ;;  %v3090_v3 = vor.u32 %v4433_v1, %v3089_v0  ;;  %v4465_v4 = vld [vmem:[#allocation2 + $0x1ec] sm:$0xf0]  ;;  %vm1274_vm0 = vcmask 130048   ;;  %s4847_s29 = smov [#allocation7]  }
   0xe   :  { %v3345_v5 = vld [vmem:[#allocation2 + $0x2e0] sm:$0xf]  ;;  %v4497_v6 = vld [vmem:[#allocation2 + $0x2ec] sm:$0xf0]  ;;  %v3218_v7 = vor.u32 %v4465_v4, %v3217_v2  ;;  %s2962_s30 = sshll.u32 %s4847_s29, 4  ;;  %s2964_s10 = sshll.u32 %s5154_s7, 4  ;;  %s2963_s30 = int_to_ptr.vmem [resolvable:$true] %s2962_s30  ;;  %s2965_s10 = int_to_ptr.hbm [resolvable:$true] %s2964_s10 }
   0xf   :  { %v3346_v8 = vor.u32 %v4497_v6, %v3345_v5  ;;  %v3473_v9 = vld [vmem:[#allocation2 + $0x3e0] sm:$0xf]  ;;  %v4529_v10 = vld [vmem:[#allocation2 + $0x3ec] sm:$0xf0]  ;;  %1278 = vmatpush.bf16.msra.mxu0 %v3090_v3 }
  0x10   :  { %v3073_v11 = vld [vmem:[#allocation2 + $0xc0] sm:$0xf]  ;;  %v3474_v12 = vor.u32 %v4529_v10, %v3473_v9  ;;  %v4429_v13 = vld [vmem:[#allocation2 + $0xcc] sm:$0xf0]  ;;  %1291 = vmatpush.bf16.msra.mxu1 %v3218_v7 }
  0x11   :  { %v3201_v14 = vld [vmem:[#allocation2 + $0x1c0] sm:$0xf]  ;;  %v4461_v15 = vld [vmem:[#allocation2 + $0x1cc] sm:$0xf0]  ;;  %1304 = vmatpush.bf16.msra.mxu2 %v3346_v8  ;;  %v3074_v16 = vor.u32 %v4429_v13, %v3073_v11 }
  0x12   :  { %v3202_v17 = vor.u32 %v4461_v15, %v3201_v14  ;;  %v3329_v18 = vld [vmem:[#allocation2 + $0x2c0] sm:$0xf]  ;;  %v4493_v19 = vld [vmem:[#allocation2 + $0x2cc] sm:$0xf0]  ;;  %1317 = vmatpush.bf16.msra.mxu3 %v3474_v12 }
  0x13   :  { %v3457_v20 = vld [vmem:[#allocation2 + $0x3c0] sm:$0xf]  ;;  %v3330_v21 = vor.u32 %v4493_v19, %v3329_v18  ;;  %v4525_v22 = vld [vmem:[#allocation2 + $0x3cc] sm:$0xf0]  ;;  %1279 = vmatpush.bf16.msra.mxu0 %v3074_v16 }
  0x14   :  { %v3057_v23 = vld [vmem:[#allocation2 + $0xa0] sm:$0xf]  ;;  %v4425_v24 = vld [vmem:[#allocation2 + $0xac] sm:$0xf0]  ;;  %v3458_v25 = vor.u32 %v4525_v22, %v3457_v20  ;;  %1292 = vmatpush.bf16.msra.mxu1 %v3202_v17 }
  0x15   :  { %v3185_v26 = vld [vmem:[#allocation2 + $0x1a0] sm:$0xf]  ;;  %v4457_v27 = vld [vmem:[#allocation2 + $0x1ac] sm:$0xf0]  ;;  %v3058_v29 = vor.u32 %v4425_v24, %v3057_v23  ;;  %1305 = vmatpush.bf16.msra.mxu2 %v3330_v21 }
  0x16   :  { %v3313_v28 = vld [vmem:[#allocation2 + $0x2a0] sm:$0xf]  ;;  %v4489_v30 = vld [vmem:[#allocation2 + $0x2ac] sm:$0xf0]  ;;  %v3186_v33 = vor.u32 %v4457_v27, %v3185_v26  ;;  %1318 = vmatpush.bf16.msra.mxu3 %v3458_v25  ;;  %v61_v25 = vld [vmem:[%s5147_s0 + $0x8] sm:$0xff] }
  0x17   :  { %v3441_v31 = vld [vmem:[#allocation2 + $0x3a0] sm:$0xf]  ;;  %v4521_v32 = vld [vmem:[#allocation2 + $0x3ac] sm:$0xf0]  ;;  %v3314_v34 = vor.u32 %v4489_v30, %v3313_v28  ;;  %1280 = vmatpush.bf16.msra.mxu0 %v3058_v29 }
  0x18   :  { %v3041_v35 = vld [vmem:[#allocation2 + $0x80] sm:$0xf]  ;;  %v4421_v36 = vld [vmem:[#allocation2 + $0x8c] sm:$0xf0]  ;;  %v3442_v38 = vor.u32 %v4521_v32, %v3441_v31  ;;  %1293 = vmatpush.bf16.msra.mxu1 %v3186_v33 }
  0x19   :  { %v3169_v37 = vld [vmem:[#allocation2 + $0x180] sm:$0xf]  ;;  %v4453_v39 = vld [vmem:[#allocation2 + $0x18c] sm:$0xf0]  ;;  %v3042_v44 = vor.u32 %v4421_v36, %v3041_v35  ;;  %1306 = vmatpush.bf16.msra.mxu2 %v3314_v34  ;;  %v4431_v34 = vld [vmem:[#allocation2 + $0xe4] sm:$0xf]  ;;  %v276_v36 = vunpack.c.l.b16 %v61_v25 }
  0x1a   :  { %v3297_v40 = vld [vmem:[#allocation2 + $0x280] sm:$0xf]  ;;  %v4485_v41 = vld [vmem:[#allocation2 + $0x28c] sm:$0xf0]  ;;  %v3170_v45 = vor.u32 %v4453_v39, %v3169_v37  ;;  %1319 = vmatpush.bf16.msra.mxu3 %v3442_v38  ;;  %v3091_v35 = vld [vmem:[#allocation2 + $0xf0] sm:$0xf0] }
  0x1b   :  { %v3425_v42 = vld [vmem:[#allocation2 + $0x380] sm:$0xf]  ;;  %v4517_v43 = vld [vmem:[#allocation2 + $0x38c] sm:$0xf0]  ;;  %v3298_v46 = vor.u32 %v4485_v41, %v3297_v40  ;;  %1281 = vmatpush.bf16.msra.mxu0 %v3042_v44 }
  0x1c   :  { %v3025_v47 = vld [vmem:[#allocation2 + $0x60] sm:$0xf]  ;;  %v4417_v48 = vld [vmem:[#allocation2 + $0x6c] sm:$0xf0]  ;;  %v3426_v50 = vor.u32 %v4517_v43, %v3425_v42  ;;  %1294 = vmatpush.bf16.msra.mxu1 %v3170_v45  ;;  %v277_v42 = vunpack.c.h.b16 %v61_v25  ;;  %v4451_v25 = vld [vmem:[#allocation2 + $0x184] sm:$0xf] }
  0x1d   :  { %v3153_v49 = vld [vmem:[#allocation2 + $0x160] sm:$0xf]  ;;  %v4449_v51 = vld [vmem:[#allocation2 + $0x16c] sm:$0xf0]  ;;  %v3026_v56 = vor.u32 %v4417_v48, %v3025_v47  ;;  %1307 = vmatpush.bf16.msra.mxu2 %v3298_v46  ;;  %v4463_v46 = vld [vmem:[#allocation2 + $0x1e4] sm:$0xf] }
  0x1e   :  { %v3281_v52 = vld [vmem:[#allocation2 + $0x260] sm:$0xf]  ;;  %v4481_v53 = vld [vmem:[#allocation2 + $0x26c] sm:$0xf0]  ;;  %v3154_v57 = vor.u32 %v4449_v51, %v3153_v49  ;;  %1320 = vmatpush.bf16.msra.mxu3 %v3426_v50  ;;  %v3219_v47 = vld [vmem:[#allocation2 + $0x1f0] sm:$0xf0]  ;;  %v3094_v49 = vor.u32 %v4431_v34, %v3091_v35 }
  0x1f   :  { %v3409_v54 = vld [vmem:[#allocation2 + $0x360] sm:$0xf]  ;;  %v4513_v55 = vld [vmem:[#allocation2 + $0x36c] sm:$0xf0]  ;;  %v3282_v58 = vor.u32 %v4481_v53, %v3281_v52  ;;  %1282 = vmatpush.bf16.msra.mxu0 %v3026_v56  ;;  %v4900_v53 = vpack.c.b16 %v276_v36, %v276_v36  ;;  %v3075_v56 = vld [vmem:[#allocation2 + $0xd0] sm:$0xf0] }
  0x20   :  { %v3009_v59 = vld [vmem:[#allocation2 + $0x40] sm:$0xf]  ;;  %v4413_v60 = vld [vmem:[#allocation2 + $0x4c] sm:$0xf0]  ;;  %v3410_v62 = vor.u32 %v4513_v55, %v3409_v54  ;;  %1295 = vmatpush.bf16.msra.mxu1 %v3154_v57  ;;  %v4427_v55 = vld [vmem:[#allocation2 + $0xc4] sm:$0xf] }
  0x21   :  { %v3137_v61 = vld [vmem:[#allocation2 + $0x140] sm:$0xf]  ;;  %v4445_v63 = vld [vmem:[#allocation2 + $0x14c] sm:$0xf0]  ;;  %v3010_v4 = vor.u32 %v4413_v60, %v3009_v59  ;;  %1308 = vmatpush.bf16.msra.mxu2 %v3282_v58  ;;  %v4904_v60 = vpack.c.b16 %v277_v42, %v277_v42  ;;  %v3027_v34 = vld [vmem:[#allocation2 + $0x70] sm:$0xf0] }
  0x22   :  { %v3265_v0 = vld [vmem:[#allocation2 + $0x240] sm:$0xf]  ;;  %v4477_v1 = vld [vmem:[#allocation2 + $0x24c] sm:$0xf0]  ;;  %v3138_v5 = vor.u32 %v4445_v63, %v3137_v61  ;;  %1321 = vmatpush.bf16.msra.mxu3 %v3410_v62  ;;  %v3222_v61 = vor.u32 %v4463_v46, %v3219_v47  ;;  %v4459_v63 = vld [vmem:[#allocation2 + $0x1c4] sm:$0xf] }
  0x23   :  { %v3393_v2 = vld [vmem:[#allocation2 + $0x340] sm:$0xf]  ;;  %v4509_v3 = vld [vmem:[#allocation2 + $0x34c] sm:$0xf0]  ;;  %v3266_v6 = vor.u32 %v4477_v1, %v3265_v0  ;;  %1283 = vmatpush.bf16.msra.mxu0 %v3010_v4  ;;  %v3203_v0 = vld [vmem:[#allocation2 + $0x1d0] sm:$0xf0] }
  0x24   :  { %v2993_v7 = vld [vmem:[#allocation2 + $0x20] sm:$0xf]  ;;  %v4409_v8 = vld [vmem:[#allocation2 + $0x2c] sm:$0xf0]  ;;  %v3394_v10 = vor.u32 %v4509_v3, %v3393_v2  ;;  %1296 = vmatpush.bf16.msra.mxu1 %v3138_v5  ;;  %v3078_v2 = vor.u32 %v4427_v55, %v3075_v56  ;;  %v4411_v46 = vld [vmem:[#allocation2 + $0x44] sm:$0xf] }
  0x25   :  { %v3121_v9 = vld [vmem:[#allocation2 + $0x120] sm:$0xf]  ;;  %v4441_v11 = vld [vmem:[#allocation2 + $0x12c] sm:$0xf0]  ;;  %v2994_v17 = vor.u32 %v4409_v8, %v2993_v7  ;;  %1309 = vmatpush.bf16.msra.mxu2 %v3266_v6  ;;  %v4423_v7 = vld [vmem:[#allocation2 + $0xa4] sm:$0xf] }
  0x26   :  { %v3249_v12 = vld [vmem:[#allocation2 + $0x220] sm:$0xf]  ;;  %v4473_v13 = vld [vmem:[#allocation2 + $0x22c] sm:$0xf0]  ;;  %v3122_v21 = vor.u32 %v4441_v11, %v3121_v9  ;;  %1322 = vmatpush.bf16.msra.mxu3 %v3394_v10  ;;  %v3059_v8 = vld [vmem:[#allocation2 + $0xb0] sm:$0xf0]  ;;  %v3206_v10 = vor.u32 %v4459_v63, %v3203_v0 }
  0x27   :  { %v3377_v14 = vld [vmem:[#allocation2 + $0x320] sm:$0xf]  ;;  %v4505_v15 = vld [vmem:[#allocation2 + $0x32c] sm:$0xf0]  ;;  %v3250_v22 = vor.u32 %v4473_v13, %v3249_v12  ;;  %1284 = vmatpush.bf16.msra.mxu0 %v2994_v17  ;;  %v4455_v12 = vld [vmem:[#allocation2 + $0x1a4] sm:$0xf] }
  0x28   :  { %v2977_v16 = vld [vmem:[#allocation2] sm:$0xf]  ;;  %v4405_v18 = vld [vmem:[#allocation2 + $0xc] sm:$0xf0]  ;;  %v3378_v26 = vor.u32 %v4505_v15, %v3377_v14  ;;  %1297 = vmatpush.bf16.msra.mxu1 %v3122_v21  ;;  %v3187_v13 = vld [vmem:[#allocation2 + $0x1b0] sm:$0xf0]  ;;  %v3062_v15 = vor.u32 %v4423_v7, %v3059_v8 }
  0x29   :  { %v3105_v19 = vld [vmem:[#allocation2 + $0x100] sm:$0xf]  ;;  %v4437_v20 = vld [vmem:[#allocation2 + $0x10c] sm:$0xf0]  ;;  %v2978_v33 = vor.u32 %v4405_v18, %v2977_v16  ;;  %1310 = vmatpush.bf16.msra.mxu2 %v3250_v22  ;;  %v3043_v21 = vld [vmem:[#allocation2 + $0x90] sm:$0xf0] }
  0x2a   :  { %v3233_v23 = vld [vmem:[#allocation2 + $0x200] sm:$0xf]  ;;  %v4469_v24 = vld [vmem:[#allocation2 + $0x20c] sm:$0xf0]  ;;  %v3106_v38 = vor.u32 %v4437_v20, %v3105_v19  ;;  %1323 = vmatpush.bf16.msra.mxu3 %v3378_v26  ;;  %v4419_v20 = vld [vmem:[#allocation2 + $0x84] sm:$0xf] }
  0x2b   :  { %v3361_v27 = vld [vmem:[#allocation2 + $0x300] sm:$0xf]  ;;  %v4501_v28 = vld [vmem:[#allocation2 + $0x30c] sm:$0xf0]  ;;  %v3234_v39 = vor.u32 %v4469_v24, %v3233_v23  ;;  %1285 = vmatpush.bf16.msra.mxu0 %v2978_v33  ;;  %v63_v22 = vld [vmem:[%s5147_s0 + $0x18] sm:$0xf]  ;;  %v3190_v23 = vor.u32 %v4455_v12, %v3187_v13 }
  0x2c   :  { %v3601_v29 = vld [vmem:[#allocation2 + $0x4e0] sm:$0xf]  ;;  %v4561_v30 = vld [vmem:[#allocation2 + $0x4ec] sm:$0xf0]  ;;  %v3362_v43 = vor.u32 %v4501_v28, %v3361_v27  ;;  %1298 = vmatpush.bf16.msra.mxu1 %v3106_v38  ;;  %v3171_v26 = vld [vmem:[#allocation2 + $0x190] sm:$0xf0]  ;;  %v3046_v28 = vor.u32 %v4419_v20, %v3043_v21  ;;  %v280_v35 = vunpack.c.l.b16 %v63_v22 }
  0x2d   :  { %v3729_v31 = vld [vmem:[#allocation2 + $0x5e0] sm:$0xf]  ;;  %v4593_v32 = vld [vmem:[#allocation2 + $0x5ec] sm:$0xf0]  ;;  %v3602_v44 = vor.u32 %v4561_v30, %v3601_v29  ;;  %1311 = vmatpush.bf16.msra.mxu2 %v3234_v39  ;;  %v4415_v33 = vld [vmem:[#allocation2 + $0x64] sm:$0xf]  ;;  %v3174_v36 = vor.u32 %v4451_v25, %v3171_v26 }
  0x2e   :  { %v60_v37 = vld [vmem:[%s5147_s0] sm:$0xff]  ;;  %v4597_v45 = vld [vmem:[#allocation2 + $0x60c] sm:$0xf0]  ;;  %v3730_v48 = vor.u32 %v4593_v32, %v3729_v31  ;;  %1324 = vmatpush.bf16.msra.mxu3 %v3362_v43  ;;  %v3155_v39 = vld [vmem:[#allocation2 + $0x170] sm:$0xf0] }
  0x2f   :  { %v3745_v40 = vld [vmem:[#allocation2 + $0x600] sm:$0xf]  ;;  %v274_v41 = vunpack.c.l.b16 %v60_v37  ;;  %v4557_v51 = vld [vmem:[#allocation2 + $0x4cc] sm:$0xf0]  ;;  %v275_v58 = vunpack.c.h.b16 %v60_v37  ;;  %1330 = vmatpush.bf16.msrb.mxu0 %v3602_v44  ;;  %v4447_v38 = vld [vmem:[#allocation2 + $0x164] sm:$0xf] }
  0x30   :  { %v3585_v50 = vld [vmem:[#allocation2 + $0x4c0] sm:$0xf]  ;;  %v4589_v54 = vld [vmem:[#allocation2 + $0x5cc] sm:$0xf0]  ;;  %v3746_v59 = vor.u32 %v4597_v45, %v3745_v40  ;;  %1343 = vmatpush.bf16.msrb.mxu1 %v3730_v48  ;;  %1312 = vmatmul.bf16.vlgmr.msra.gmra.mxu2 %v4900_v53  ;;  %v3011_v47 = vld [vmem:[#allocation2 + $0x50] sm:$0xf0]  ;;  %v4915_v48 = vpack.c.b16 %v280_v35, %v280_v35 }
  0x31   :  { %v3713_v52 = vld [vmem:[#allocation2 + $0x5c0] sm:$0xf]  ;;  %v4902_v57 = vpack.c.b16 %v274_v41, %v274_v41  ;;  %v3586_v62 = vor.u32 %v4557_v51, %v3585_v50  ;;  %v4553_v4 = vld [vmem:[#allocation2 + $0x4ac] sm:$0xf0]  ;;  %v4908_v9 = vpack.c.b16 %v275_v58, %v275_v58  ;;  %1325 = vmatmul.bf16.vlgmr.msra.gmra.mxu3 %v4904_v60  ;;  %v3030_v41 = vor.u32 %v4415_v33, %v3027_v34  ;;  %v4443_v51 = vld [vmem:[#allocation2 + $0x144] sm:$0xf] }
  0x32   :  { %1369 = vmatpush.bf16.msrb.mxu3 %v3094_v49  ;;  %v3714_v1 = vor.u32 %v4589_v54, %v3713_v52  ;;  %v3569_v3 = vld [vmem:[#allocation2 + $0x4a0] sm:$0xf]  ;;  %v4585_v6 = vld [vmem:[#allocation2 + $0x5ac] sm:$0xf0]  ;;  %1363 = vmatpush.bf16.msrb.mxu2 %v3746_v59  ;;  %v3158_v49 = vor.u32 %v4447_v38, %v3155_v39  ;;  %v3139_v52 = vld [vmem:[#allocation2 + $0x150] sm:$0xf0]  ;;  %v3014_v55 = vor.u32 %v4411_v46, %v3011_v47 }
  0x33   :  { %v3697_v5 = vld [vmem:[#allocation2 + $0x5a0] sm:$0xf]  ;;  %1286 = vmatmul.bf16.vlgmr.msra.gmra.mxu0 %v4902_v57  ;;  %v3570_v11 = vor.u32 %v4553_v4, %v3569_v3  ;;  %v4549_v17 = vld [vmem:[#allocation2 + $0x48c] sm:$0xf0]  ;;  %1299 = vmatmul.bf16.vlgmr.msra.gmra.mxu1 %v4908_v9  ;;  %v2995_v63 = vld [vmem:[#allocation2 + $0x30] sm:$0xf0] }
  0x34   :  { %1331 = vmatpush.bf16.msrb.mxu0 %v3586_v62  ;;  %1344 = vmatpush.bf16.msrb.mxu1 %v3714_v1  ;;  %v3698_v14 = vor.u32 %v4585_v6, %v3697_v5  ;;  %v3553_v16 = vld [vmem:[#allocation2 + $0x480] sm:$0xf]  ;;  %v4581_v19 = vld [vmem:[#allocation2 + $0x58c] sm:$0xf0]  ;;  %v4407_v62 = vld [vmem:[#allocation2 + $0x24] sm:$0xf]  ;;  %v3142_v1 = vor.u32 %v4443_v51, %v3139_v52 }
  0x35   :  { %v3681_v18 = vld [vmem:[#allocation2 + $0x580] sm:$0xf]  ;;  %v3554_v24 = vor.u32 %v4549_v17, %v3553_v16  ;;  %v4545_v30 = vld [vmem:[#allocation2 + $0x46c] sm:$0xf0]  ;;  %v4439_v0 = vld [vmem:[#allocation2 + $0x124] sm:$0xf]  ;;  %v2998_v7 = vor.u32 %v4407_v62, %v2995_v63 }
  0x36   :  { %1382 = vmatpush.bf16.msra.mxu2 %v3222_v61  ;;  %1370 = vmatpush.bf16.msrb.mxu3 %v3078_v2  ;;  %v3682_v27 = vor.u32 %v4581_v19, %v3681_v18  ;;  %v3537_v29 = vld [vmem:[#allocation2 + $0x460] sm:$0xf]  ;;  %v4577_v32 = vld [vmem:[#allocation2 + $0x56c] sm:$0xf0]  ;;  %v3123_v3 = vld [vmem:[#allocation2 + $0x130] sm:$0xf0] }
  0x37   :  { %v3665_v31 = vld [vmem:[#allocation2 + $0x560] sm:$0xf]  ;;  %v3538_v37 = vor.u32 %v4545_v30, %v3537_v29  ;;  %v4541_v43 = vld [vmem:[#allocation2 + $0x44c] sm:$0xf0]  ;;  %v4403_v12 = vld [vmem:[#allocation2 + $0x4] sm:$0xf]  ;;  %v3126_v19 = vor.u32 %v4439_v0, %v3123_v3 }
  0x38   :  { %1332 = vmatpush.bf16.msrb.mxu0 %v3570_v11  ;;  %1345 = vmatpush.bf16.msrb.mxu1 %v3698_v14  ;;  %v3666_v40 = vor.u32 %v4577_v32, %v3665_v31  ;;  %v3521_v42 = vld [vmem:[#allocation2 + $0x440] sm:$0xf]  ;;  %v4573_v45 = vld [vmem:[#allocation2 + $0x54c] sm:$0xf0]  ;;  %v2979_v13 = vld [vmem:[#allocation2 + $0x10] sm:$0xf0] }
  0x39   :  { %v3649_v44 = vld [vmem:[#allocation2 + $0x540] sm:$0xf]  ;;  %v3522_v50 = vor.u32 %v4541_v43, %v3521_v42  ;;  %v4537_v58 = vld [vmem:[#allocation2 + $0x42c] sm:$0xf0]  ;;  %v4495_v14 = vld [vmem:[#allocation2 + $0x2e4] sm:$0xf]  ;;  %v2982_v25 = vor.u32 %v4403_v12, %v2979_v13 }
  0x3a   :  { %1383 = vmatpush.bf16.msra.mxu2 %v3206_v10  ;;  %1371 = vmatpush.bf16.msrb.mxu3 %v3062_v15  ;;  %v3650_v54 = vor.u32 %v4573_v45, %v3649_v44  ;;  %v3505_v56 = vld [vmem:[#allocation2 + $0x420] sm:$0xf]  ;;  %v4569_v61 = vld [vmem:[#allocation2 + $0x52c] sm:$0xf0]  ;;  %v3347_v15 = vld [vmem:[#allocation2 + $0x2f0] sm:$0xf0] }
  0x3b   :  { %v3633_v59 = vld [vmem:[#allocation2 + $0x520] sm:$0xf]  ;;  %v3506_v2 = vor.u32 %v4537_v58, %v3505_v56  ;;  %v62_v5 = vld [vmem:[%s5147_s0 + $0x10] sm:$0xff]  ;;  %v4527_v16 = vld [vmem:[#allocation2 + $0x3e4] sm:$0xf] }
  0x3c   :  { %1333 = vmatpush.bf16.msrb.mxu0 %v3554_v24  ;;  %1346 = vmatpush.bf16.msrb.mxu1 %v3682_v27  ;;  %v3489_v4 = vld [vmem:[#allocation2 + $0x400] sm:$0xf]  ;;  %v3634_v6 = vor.u32 %v4569_v61, %v3633_v59  ;;  %v4533_v8 = vld [vmem:[#allocation2 + $0x40c] sm:$0xf0]  ;;  %v3475_v17 = vld [vmem:[#allocation2 + $0x3f0] sm:$0xf0]  ;;  %v278_v18 = vunpack.c.l.b16 %v62_v5 }
  0x3d   :  { %v3617_v10 = vld [vmem:[#allocation2 + $0x500] sm:$0xf]  ;;  %v4565_v11 = vld [vmem:[#allocation2 + $0x50c] sm:$0xf0]  ;;  %v3490_v20 = vor.u32 %v4533_v8, %v3489_v4  ;;  %v4559_v21 = vld [vmem:[#allocation2 + $0x4e4] sm:$0xf]  ;;  %v3478_v29 = vor.u32 %v4527_v16, %v3475_v17 }
  0x3e   :  { %1384 = vmatpush.bf16.msra.mxu2 %v3190_v23  ;;  %1372 = vmatpush.bf16.msrb.mxu3 %v3046_v28  ;;  %v3603_v22 = vld [vmem:[#allocation2 + $0x4f0] sm:$0xf0]  ;;  %v279_v23 = vunpack.c.h.b16 %v62_v5  ;;  %v3618_v24 = vor.u32 %v4565_v11, %v3617_v10  ;;  %v4435_v26 = vld [vmem:[#allocation2 + $0x104] sm:$0xf]  ;;  %v3350_v28 = vor.u32 %v4495_v14, %v3347_v15  ;;  %v4922_v34 = vpack.c.b16 %v278_v18, %v278_v18 }
  0x3f   :  { %v3107_v27 = vld [vmem:[#allocation2 + $0x110] sm:$0xf0]  ;;  %v4591_v30 = vld [vmem:[#allocation2 + $0x5e4] sm:$0xf]  ;;  %v3606_v33 = vor.u32 %v4559_v21, %v3603_v22 }
  0x40   :  { %1334 = vmatpush.bf16.msrb.mxu0 %v3538_v37  ;;  %1347 = vmatpush.bf16.msrb.mxu1 %v3666_v40  ;;  %v3731_v31 = vld [vmem:[#allocation2 + $0x5f0] sm:$0xf0]  ;;  %v4491_v32 = vld [vmem:[#allocation2 + $0x2c4] sm:$0xf]  ;;  %v3110_v38 = vor.u32 %v4435_v26, %v3107_v27  ;;  %v4924_v39 = vpack.c.b16 %v279_v23, %v279_v23 }
  0x41   :  { %3759 = vmatmul.msk.bf16.vlgmr.msrb.gmra.mxu2 %vm1274_vm0, %v4915_v48  ;;  %v3331_v35 = vld [vmem:[#allocation2 + $0x2d0] sm:$0xf0]  ;;  %v4555_v40 = vld [vmem:[#allocation2 + $0x4c4] sm:$0xf]  ;;  %v3734_v42 = vor.u32 %v4591_v30, %v3731_v31 }
  0x42   :  { %1385 = vmatpush.bf16.msra.mxu2 %v3174_v36  ;;  %1373 = vmatpush.bf16.msrb.mxu3 %v3030_v41  ;;  %v4523_v36 = vld [vmem:[#allocation2 + $0x3c4] sm:$0xf]  ;;  %v3459_v37 = vld [vmem:[#allocation2 + $0x3d0] sm:$0xf0]  ;;  %v3334_v43 = vor.u32 %v4491_v32, %v3331_v35 }
  0x43   :  { %v3587_v41 = vld [vmem:[#allocation2 + $0x4d0] sm:$0xf0]  ;;  %v3462_v44 = vor.u32 %v4523_v36, %v3459_v37  ;;  %v4587_v45 = vld [vmem:[#allocation2 + $0x5c4] sm:$0xf] }
  0x44   :  { %1335 = vmatpush.bf16.msrb.mxu0 %v3522_v50  ;;  %1348 = vmatpush.bf16.msrb.mxu1 %v3650_v54  ;;  %v3715_v46 = vld [vmem:[#allocation2 + $0x5d0] sm:$0xf0]  ;;  %v4487_v47 = vld [vmem:[#allocation2 + $0x2a4] sm:$0xf] }
  0x45   :  { %v3315_v50 = vld [vmem:[#allocation2 + $0x2b0] sm:$0xf0]  ;;  %v4519_v51 = vld [vmem:[#allocation2 + $0x3a4] sm:$0xf]  ;;  %v3718_v56 = vor.u32 %v4587_v45, %v3715_v46 }
  0x46   :  { %1386 = vmatpush.bf16.msra.mxu2 %v3158_v49  ;;  %1374 = vmatpush.bf16.msrb.mxu3 %v3014_v55  ;;  %v3590_v49 = vor.u32 %v4555_v40, %v3587_v41  ;;  %v3443_v52 = vld [vmem:[#allocation2 + $0x3b0] sm:$0xf0]  ;;  %v4551_v54 = vld [vmem:[#allocation2 + $0x4a4] sm:$0xf]  ;;  %v3318_v58 = vor.u32 %v4487_v47, %v3315_v50 }
  0x47   :  { %v3571_v55 = vld [vmem:[#allocation2 + $0x4b0] sm:$0xf0]  ;;  %v3446_v59 = vor.u32 %v4519_v51, %v3443_v52  ;;  %v4583_v61 = vld [vmem:[#allocation2 + $0x5a4] sm:$0xf] }
  0x48   :  { %1336 = vmatpush.bf16.msrb.mxu0 %v3506_v2  ;;  %1349 = vmatpush.bf16.msrb.mxu1 %v3634_v6  ;;  %v3699_v62 = vld [vmem:[#allocation2 + $0x5b0] sm:$0xf0]  ;;  %v4483_v63 = vld [vmem:[#allocation2 + $0x284] sm:$0xf]  ;;  %v3574_v0 = vor.u32 %v4551_v54, %v3571_v55 }
  0x49   :  { %v4515_v2 = vld [vmem:[#allocation2 + $0x384] sm:$0xf]  ;;  %v3427_v3 = vld [vmem:[#allocation2 + $0x390] sm:$0xf0]  ;;  %v3702_v6 = vor.u32 %v4583_v61, %v3699_v62  ;;  %v3097_v61 = vld [vmem:[#allocation2 + $0xe8] sm:$0xf] }
  0x4a   :  { %1387 = vmatpush.bf16.msra.mxu2 %v3142_v1  ;;  %1375 = vmatpush.bf16.msrb.mxu3 %v2998_v7  ;;  %v3299_v1 = vld [vmem:[#allocation2 + $0x290] sm:$0xf0]  ;;  %v4547_v4 = vld [vmem:[#allocation2 + $0x484] sm:$0xf]  ;;  %v3430_v8 = vor.u32 %v4515_v2, %v3427_v3  ;;  %v4434_v62 = vld [vmem:[#allocation2 + $0xf4] sm:$0xf0] }
  0x4b   :  { %v3555_v5 = vld [vmem:[#allocation2 + $0x490] sm:$0xf0]  ;;  %v3302_v7 = vor.u32 %v4483_v63, %v3299_v1  ;;  %v4579_v10 = vld [vmem:[#allocation2 + $0x584] sm:$0xf]  ;;  %v3353_v2 = vld [vmem:[#allocation2 + $0x2e8] sm:$0xf] }
  0x4c   :  { %1337 = vmatpush.bf16.msrb.mxu0 %v3490_v20  ;;  %1350 = vmatpush.bf16.msrb.mxu1 %v3618_v24  ;;  %v3683_v11 = vld [vmem:[#allocation2 + $0x590] sm:$0xf0]  ;;  %v4479_v12 = vld [vmem:[#allocation2 + $0x264] sm:$0xf]  ;;  %v3558_v13 = vor.u32 %v4547_v4, %v3555_v5  ;;  %v4498_v3 = vld [vmem:[#allocation2 + $0x2f4] sm:$0xf0] }
  0x4d   :  { %v3283_v14 = vld [vmem:[#allocation2 + $0x270] sm:$0xf0]  ;;  %v4511_v15 = vld [vmem:[#allocation2 + $0x364] sm:$0xf] }
  0x4e   :  { %1388 = vmatpush.bf16.msra.mxu2 %v3126_v19  ;;  %1376 = vmatpush.bf16.msrb.mxu3 %v2982_v25  ;;  %v3411_v16 = vld [vmem:[#allocation2 + $0x370] sm:$0xf0]  ;;  %v4543_v17 = vld [vmem:[#allocation2 + $0x464] sm:$0xf]  ;;  %v3686_v19 = vor.u32 %v4579_v10, %v3683_v11  ;;  %v3286_v20 = vor.u32 %v4479_v12, %v3283_v14  ;;  %v3098_v10 = vor.u32 %v4434_v62, %v3097_v61  ;;  %v3481_v11 = vld [vmem:[#allocation2 + $0x3e8] sm:$0xf] }
  0x4f   :  { %1338 = vmatmul.bf16.vlgmr.msrb.gmra.mxu0 %v4922_v34  ;;  %1351 = vmatmul.bf16.vlgmr.msrb.gmra.mxu1 %v4924_v39  ;;  %v3539_v18 = vld [vmem:[#allocation2 + $0x470] sm:$0xf0]  ;;  %v3414_v21 = vor.u32 %v4511_v15, %v3411_v16  ;;  %v4575_v22 = vld [vmem:[#allocation2 + $0x564] sm:$0xf]  ;;  %v4530_v12 = vld [vmem:[#allocation2 + $0x3f4] sm:$0xf0]  ;;  %v3354_v16 = vor.u32 %v4498_v3, %v3353_v2 }
  0x50   :  { %1395 = vmatpush.bf16.msra.mxu0 %v3350_v28  ;;  %1408 = vmatpush.bf16.msra.mxu1 %v3478_v29  ;;  %v3667_v23 = vld [vmem:[#allocation2 + $0x570] sm:$0xf0]  ;;  %v4475_v24 = vld [vmem:[#allocation2 + $0x244] sm:$0xf]  ;;  %v3542_v25 = vor.u32 %v4543_v17, %v3539_v18  ;;  %v3225_v14 = vld [vmem:[#allocation2 + $0x1e8] sm:$0xf] }
  0x51   :  { %1377 = vmatmul.bf16.vlgmr.msrb.gmra.mxu3 %v4902_v57  ;;  %v3267_v26 = vld [vmem:[#allocation2 + $0x250] sm:$0xf0]  ;;  %v4507_v27 = vld [vmem:[#allocation2 + $0x344] sm:$0xf]  ;;  %v3670_v31 = vor.u32 %v4575_v22, %v3667_v23  ;;  %v4466_v15 = vld [vmem:[#allocation2 + $0x1f4] sm:$0xf0] }
  0x52   :  { %1421 = vmatpush.bf16.msra.mxu3 %v3606_v33  ;;  %1389 = vmatpush.bf16.msra.mxu2 %v3110_v38  ;;  %v3395_v28 = vld [vmem:[#allocation2 + $0x350] sm:$0xf0]  ;;  %v4539_v29 = vld [vmem:[#allocation2 + $0x444] sm:$0xf]  ;;  %v3270_v33 = vor.u32 %v4475_v24, %v3267_v26  ;;  %v3081_v18 = vld [vmem:[#allocation2 + $0xc8] sm:$0xf]  ;;  %v3226_v23 = vor.u32 %v4466_v15, %v3225_v14 }
  0x53   :  { %v3523_v30 = vld [vmem:[#allocation2 + $0x450] sm:$0xf0]  ;;  %v4571_v32 = vld [vmem:[#allocation2 + $0x544] sm:$0xf]  ;;  %v3398_v35 = vor.u32 %v4507_v27, %v3395_v28  ;;  %v4494_v22 = vld [vmem:[#allocation2 + $0x2d4] sm:$0xf0] }
  0x54   :  { %1396 = vmatpush.bf16.msra.mxu0 %v3334_v43  ;;  %1409 = vmatpush.bf16.msra.mxu1 %v3462_v44  ;;  %v3651_v36 = vld [vmem:[#allocation2 + $0x550] sm:$0xf0]  ;;  %v4471_v37 = vld [vmem:[#allocation2 + $0x224] sm:$0xf]  ;;  %v3526_v40 = vor.u32 %v4539_v29, %v3523_v30  ;;  %v3465_v24 = vld [vmem:[#allocation2 + $0x3c8] sm:$0xf] }
  0x55   :  { %1390 = vmatmul.bf16.vlgmr.msra.gmra.mxu2 %v4908_v9  ;;  %v3251_v38 = vld [vmem:[#allocation2 + $0x230] sm:$0xf0]  ;;  %v4503_v41 = vld [vmem:[#allocation2 + $0x324] sm:$0xf]  ;;  %v3654_v45 = vor.u32 %v4571_v32, %v3651_v36  ;;  %v3209_v27 = vld [vmem:[#allocation2 + $0x1c8] sm:$0xf] }
  0x56   :  { %1434 = vmatpush.bf16.msrb.mxu2 %v3734_v42  ;;  %1422 = vmatpush.bf16.msra.mxu3 %v3590_v49  ;;  %v3379_v42 = vld [vmem:[#allocation2 + $0x330] sm:$0xf0]  ;;  %v4535_v43 = vld [vmem:[#allocation2 + $0x424] sm:$0xf]  ;;  %v3254_v49 = vor.u32 %v4471_v37, %v3251_v38  ;;  %v4462_v28 = vld [vmem:[#allocation2 + $0x1d4] sm:$0xf0] }
  0x57   :  { %v3507_v44 = vld [vmem:[#allocation2 + $0x430] sm:$0xf0]  ;;  %v4567_v46 = vld [vmem:[#allocation2 + $0x524] sm:$0xf]  ;;  %v3382_v50 = vor.u32 %v4503_v41, %v3379_v42  ;;  %v3065_v30 = vld [vmem:[#allocation2 + $0xa8] sm:$0xf]  ;;  %v3210_v36 = vor.u32 %v4462_v28, %v3209_v27 }
  0x58   :  { %1397 = vmatpush.bf16.msra.mxu0 %v3318_v58  ;;  %1410 = vmatpush.bf16.msra.mxu1 %v3446_v59  ;;  %v3635_v47 = vld [vmem:[#allocation2 + $0x530] sm:$0xf0]  ;;  %v4467_v51 = vld [vmem:[#allocation2 + $0x204] sm:$0xf]  ;;  %v3510_v55 = vor.u32 %v4535_v43, %v3507_v44  ;;  %v3449_v37 = vld [vmem:[#allocation2 + $0x3a8] sm:$0xf] }
  0x59   :  { %v3235_v52 = vld [vmem:[#allocation2 + $0x210] sm:$0xf0]  ;;  %v4499_v54 = vld [vmem:[#allocation2 + $0x304] sm:$0xf]  ;;  %v4522_v38 = vld [vmem:[#allocation2 + $0x3b4] sm:$0xf0] }
  0x5a   :  { %1435 = vmatpush.bf16.msrb.mxu2 %v3718_v56  ;;  %1423 = vmatpush.bf16.msra.mxu3 %v3574_v0  ;;  %v3363_v56 = vld [vmem:[#allocation2 + $0x310] sm:$0xf0]  ;;  %v4531_v58 = vld [vmem:[#allocation2 + $0x404] sm:$0xf]  ;;  %v3638_v0 = vor.u32 %v4567_v46, %v3635_v47  ;;  %v3238_v4 = vor.u32 %v4467_v51, %v3235_v52  ;;  %v3193_v41 = vld [vmem:[#allocation2 + $0x1a8] sm:$0xf]  ;;  %v3450_v46 = vor.u32 %v4522_v38, %v3449_v37 }
  0x5b   :  { %v3491_v59 = vld [vmem:[#allocation2 + $0x410] sm:$0xf0]  ;;  %v4595_v63 = vld [vmem:[#allocation2 + $0x604] sm:$0xf]  ;;  %v3366_v5 = vor.u32 %v4499_v54, %v3363_v56  ;;  %v4458_v42 = vld [vmem:[#allocation2 + $0x1b4] sm:$0xf0] }
  0x5c   :  { %1398 = vmatpush.bf16.msra.mxu0 %v3302_v7  ;;  %1411 = vmatpush.bf16.msra.mxu1 %v3430_v8  ;;  %v3747_v1 = vld [vmem:[#allocation2 + $0x610] sm:$0xf0]  ;;  %v3494_v8 = vor.u32 %v4531_v58, %v3491_v59  ;;  %v3049_v44 = vld [vmem:[#allocation2 + $0x88] sm:$0xf]  ;;  %v4518_v52 = vld [vmem:[#allocation2 + $0x394] sm:$0xf0] }
  0x5d   :  { %v3619_v7 = vld [vmem:[#allocation2 + $0x510] sm:$0xf0]  ;;  %v3305_v47 = vld [vmem:[#allocation2 + $0x288] sm:$0xf]  ;;  %v4454_v56 = vld [vmem:[#allocation2 + $0x194] sm:$0xf0] }
  0x5e   :  { %1436 = vmatpush.bf16.msrb.mxu2 %v3702_v6  ;;  %1424 = vmatpush.bf16.msra.mxu3 %v3558_v13  ;;  %v4563_v6 = vld [vmem:[#allocation2 + $0x504] sm:$0xf]  ;;  %v3750_v13 = vor.u32 %v4595_v63, %v3747_v1  ;;  %v3433_v51 = vld [vmem:[#allocation2 + $0x388] sm:$0xf]  ;;  %v4418_v61 = vld [vmem:[#allocation2 + $0x74] sm:$0xf0] }
  0x5f   :  { %v3622_v17 = vor.u32 %v4563_v6, %v3619_v7  ;;  %v3033_v59 = vld [vmem:[#allocation2 + $0x68] sm:$0xf]  ;;  %v3434_v62 = vor.u32 %v4518_v52, %v3433_v51  ;;  %v4514_v3 = vld [vmem:[#allocation2 + $0x374] sm:$0xf0]  ;;  %v4432_v51 = vld [vmem:[#allocation2 + $0xec] sm:$0xf] }
  0x60   :  { %1399 = vmatpush.bf16.msra.mxu0 %v3286_v20  ;;  %1412 = vmatpush.bf16.msra.mxu1 %v3414_v21  ;;  %v3482_v20 = vor.u32 %v4530_v12, %v3481_v11  ;;  %v3337_v21 = vld [vmem:[#allocation2 + $0x2c8] sm:$0xf]  ;;  %v4450_v6 = vld [vmem:[#allocation2 + $0x174] sm:$0xf0]  ;;  %v3099_v52 = vld [vmem:[#allocation2 + $0xf8] sm:$0xf0] }
  0x61   :  { %v3338_v29 = vor.u32 %v4494_v22, %v3337_v21  ;;  %v3289_v63 = vld [vmem:[#allocation2 + $0x268] sm:$0xf]  ;;  %v4410_v22 = vld [vmem:[#allocation2 + $0x34] sm:$0xf0] }
  0x62   :  { %1437 = vmatpush.bf16.msrb.mxu2 %v3686_v19  ;;  %1425 = vmatpush.bf16.msra.mxu3 %v3542_v25  ;;  %v4430_v19 = vld [vmem:[#allocation2 + $0xd4] sm:$0xf0]  ;;  %v3417_v2 = vld [vmem:[#allocation2 + $0x368] sm:$0xf] }
  0x63   :  { %v4526_v25 = vld [vmem:[#allocation2 + $0x3d4] sm:$0xf0]  ;;  %v3082_v26 = vor.u32 %v4430_v19, %v3081_v18  ;;  %v3418_v11 = vor.u32 %v4514_v3, %v3417_v2  ;;  %v3273_v12 = vld [vmem:[#allocation2 + $0x248] sm:$0xf]  ;;  %v3102_v3 = vor.u32 %v4432_v51, %v3099_v52 }
  0x64   :  { %1400 = vmatpush.bf16.msra.mxu0 %v3270_v33  ;;  %1413 = vmatpush.bf16.msra.mxu1 %v3398_v35  ;;  %v3466_v32 = vor.u32 %v4526_v25, %v3465_v24  ;;  %v3321_v33 = vld [vmem:[#allocation2 + $0x2a8] sm:$0xf]  ;;  %v4490_v35 = vld [vmem:[#allocation2 + $0x2b4] sm:$0xf0] }
  0x65   :  { %v3322_v43 = vor.u32 %v4490_v35, %v3321_v33  ;;  %v3401_v15 = vld [vmem:[#allocation2 + $0x348] sm:$0xf]  ;;  %v4446_v19 = vld [vmem:[#allocation2 + $0x154] sm:$0xf0] }
  0x66   :  { %1438 = vmatpush.bf16.msrb.mxu2 %v3670_v31  ;;  %1426 = vmatpush.bf16.msra.mxu3 %v3526_v40  ;;  %v4426_v31 = vld [vmem:[#allocation2 + $0xb4] sm:$0xf0]  ;;  %v3145_v18 = vld [vmem:[#allocation2 + $0x148] sm:$0xf] }
  0x67   :  { %v3066_v40 = vor.u32 %v4426_v31, %v3065_v30  ;;  %v3001_v21 = vld [vmem:[#allocation2 + $0x28] sm:$0xf]  ;;  %v4474_v25 = vld [vmem:[#allocation2 + $0x234] sm:$0xf0] }
  0x68   :  { %1401 = vmatpush.bf16.msra.mxu0 %v3254_v49  ;;  %1414 = vmatpush.bf16.msra.mxu1 %v3382_v50  ;;  %v4486_v49 = vld [vmem:[#allocation2 + $0x294] sm:$0xf0]  ;;  %v3194_v50 = vor.u32 %v4458_v42, %v3193_v41  ;;  %v3257_v24 = vld [vmem:[#allocation2 + $0x228] sm:$0xf] }
  0x69   :  { %v3306_v58 = vor.u32 %v4486_v49, %v3305_v47  ;;  %v3385_v27 = vld [vmem:[#allocation2 + $0x328] sm:$0xf]  ;;  %v4506_v28 = vld [vmem:[#allocation2 + $0x334] sm:$0xf0]  ;;  %v3258_v33 = vor.u32 %v4474_v25, %v3257_v24 }
  0x6a   :  { %1439 = vmatpush.bf16.msrb.mxu2 %v3654_v45  ;;  %1427 = vmatpush.bf16.msra.mxu3 %v3510_v55  ;;  %v4422_v45 = vld [vmem:[#allocation2 + $0x94] sm:$0xf0]  ;;  %v3177_v55 = vld [vmem:[#allocation2 + $0x188] sm:$0xf]  ;;  %v3386_v38 = vor.u32 %v4506_v28, %v3385_v27  ;;  %v3195_v27 = vld [vmem:[#allocation2 + $0x1b8] sm:$0xf0] }
  0x6b   :  { %v3050_v54 = vor.u32 %v4422_v45, %v3049_v44  ;;  %v3178_v1 = vor.u32 %v4454_v56, %v3177_v55  ;;  %v3129_v30 = vld [vmem:[#allocation2 + $0x128] sm:$0xf]  ;;  %v4442_v31 = vld [vmem:[#allocation2 + $0x134] sm:$0xf0] }
  0x6c   :  { %1402 = vmatpush.bf16.msra.mxu0 %v3238_v4  ;;  %1415 = vmatpush.bf16.msra.mxu1 %v3366_v5  ;;  %v3034_v4 = vor.u32 %v4418_v61, %v3033_v59  ;;  %v3161_v5 = vld [vmem:[#allocation2 + $0x168] sm:$0xf]  ;;  %v4406_v35 = vld [vmem:[#allocation2 + $0x14] sm:$0xf0]  ;;  %v3130_v44 = vor.u32 %v4442_v31, %v3129_v30  ;;  %v4420_v30 = vld [vmem:[#allocation2 + $0x8c] sm:$0xf] }
  0x6d   :  { %v3162_v14 = vor.u32 %v4450_v6, %v3161_v5  ;;  %v4562_v37 = vld [vmem:[#allocation2 + $0x4f4] sm:$0xf0]  ;;  %v3241_v41 = vld [vmem:[#allocation2 + $0x208] sm:$0xf]  ;;  %v4428_v5 = vld [vmem:[#allocation2 + $0xcc] sm:$0xf] }
  0x6e   :  { %1440 = vmatpush.bf16.msrb.mxu2 %v3638_v0  ;;  %1428 = vmatpush.bf16.msra.mxu3 %v3494_v8  ;;  %v4482_v0 = vld [vmem:[#allocation2 + $0x274] sm:$0xf0]  ;;  %v3017_v8 = vld [vmem:[#allocation2 + $0x48] sm:$0xf]  ;;  %v3083_v6 = vld [vmem:[#allocation2 + $0xd8] sm:$0xf0] }
  0x6f   :  { %1403 = vmatmul.bf16.vlgmr.msra.gmra.mxu0 %v4900_v53  ;;  %1416 = vmatmul.bf16.vlgmr.msra.gmra.mxu1 %v4904_v60  ;;  %v3290_v7 = vor.u32 %v4482_v0, %v3289_v63  ;;  %v4470_v42 = vld [vmem:[#allocation2 + $0x214] sm:$0xf0]  ;;  %v3737_v56 = vld [vmem:[#allocation2 + $0x5e8] sm:$0xf]  ;;  %v4464_v0 = vld [vmem:[#allocation2 + $0x1ec] sm:$0xf] }
  0x70   :  { %1460 = vmatpush.bf16.msrb.mxu1 %v3098_v10  ;;  %1486 = vmatpush.bf16.msrb.mxu0 %v3354_v16  ;;  %v4414_v10 = vld [vmem:[#allocation2 + $0x54] sm:$0xf0]  ;;  %v3242_v55 = vor.u32 %v4470_v42, %v3241_v41  ;;  %v3593_v59 = vld [vmem:[#allocation2 + $0x4c8] sm:$0xf]  ;;  %v3051_v31 = vld [vmem:[#allocation2 + $0x98] sm:$0xf0] }
  0x71   :  { %1429 = vmatmul.bf16.vlgmr.msra.gmra.mxu3 %v4922_v34  ;;  %v4510_v16 = vld [vmem:[#allocation2 + $0x354] sm:$0xf0]  ;;  %v3561_v24 = vld [vmem:[#allocation2 + $0x488] sm:$0xf]  ;;  %v3179_v41 = vld [vmem:[#allocation2 + $0x198] sm:$0xf0]  ;;  %v3054_v42 = vor.u32 %v4420_v30, %v3051_v31 }
  0x72   :  { %1454 = vmatpush.bf16.msrb.mxu3 %v3750_v13  ;;  %1441 = vmatpush.bf16.msrb.mxu2 %v3622_v17  ;;  %v4478_v13 = vld [vmem:[#allocation2 + $0x254] sm:$0xf0]  ;;  %v3018_v17 = vor.u32 %v4414_v10, %v3017_v8  ;;  %v3721_v10 = vld [vmem:[#allocation2 + $0x5c8] sm:$0xf]  ;;  %v3483_v30 = vld [vmem:[#allocation2 + $0x3f8] sm:$0xf0] }
  0x73   :  { %v4502_v45 = vld [vmem:[#allocation2 + $0x314] sm:$0xf0]  ;;  %v3529_v51 = vld [vmem:[#allocation2 + $0x448] sm:$0xf] }
  0x74   :  { %1461 = vmatpush.bf16.msrb.mxu1 %v3082_v26  ;;  %1487 = vmatpush.bf16.msrb.mxu0 %v3338_v29  ;;  %v3146_v26 = vor.u32 %v4446_v19, %v3145_v18  ;;  %v3002_v29 = vor.u32 %v4410_v22, %v3001_v21  ;;  %v4598_v47 = vld [vmem:[#allocation2 + $0x614] sm:$0xf0]  ;;  %v4424_v18 = vld [vmem:[#allocation2 + $0xac] sm:$0xf]  ;;  %v3067_v19 = vld [vmem:[#allocation2 + $0xb8] sm:$0xf0] }
  0x75   :  { %1442 = vmatmul.bf16.vlgmr.msrb.gmra.mxu2 %v4924_v39  ;;  %v3705_v22 = vld [vmem:[#allocation2 + $0x5a8] sm:$0xf]  ;;  %v4550_v25 = vld [vmem:[#allocation2 + $0x494] sm:$0xf0]  ;;  %v3070_v28 = vor.u32 %v4424_v18, %v3067_v19  ;;  %v3131_v18 = vld [vmem:[#allocation2 + $0x138] sm:$0xf0] }
  0x76   :  { %1499 = vmatpush.bf16.msra.mxu2 %v3482_v20  ;;  %1473 = vmatpush.bf16.msra.mxu3 %v3226_v23  ;;  %v3274_v20 = vor.u32 %v4478_v13, %v3273_v12  ;;  %v3402_v23 = vor.u32 %v4510_v16, %v3401_v15  ;;  %v3577_v12 = vld [vmem:[#allocation2 + $0x4a8] sm:$0xf]  ;;  %v4554_v13 = vld [vmem:[#allocation2 + $0x4b4] sm:$0xf0]  ;;  %v3211_v15 = vld [vmem:[#allocation2 + $0x1d8] sm:$0xf0]  ;;  %v3086_v16 = vor.u32 %v4428_v5, %v3083_v6 }
  0x77   :  { %v4542_v52 = vld [vmem:[#allocation2 + $0x454] sm:$0xf0]  ;;  %v3147_v5 = vld [vmem:[#allocation2 + $0x158] sm:$0xf0] }
  0x78   :  { %1462 = vmatpush.bf16.msrb.mxu1 %v3066_v40  ;;  %1488 = vmatpush.bf16.msrb.mxu0 %v3322_v43  ;;  %v3113_v40 = vld [vmem:[#allocation2 + $0x108] sm:$0xf] }
  0x79   :  { %v3369_v43 = vld [vmem:[#allocation2 + $0x308] sm:$0xf] }
  0x7a   :  { %1500 = vmatpush.bf16.msra.mxu2 %v3466_v32  ;;  %1474 = vmatpush.bf16.msra.mxu3 %v3210_v36  ;;  %v2985_v32 = vld [vmem:[#allocation2 + $0x8] sm:$0xf]  ;;  %v3370_v61 = vor.u32 %v4502_v45, %v3369_v43  ;;  %v3035_v45 = vld [vmem:[#allocation2 + $0x78] sm:$0xf0] }
  0x7b   :  { %v3609_v36 = vld [vmem:[#allocation2 + $0x4e8] sm:$0xf]  ;;  %v2986_v49 = vor.u32 %v4406_v35, %v2985_v32  ;;  %v3562_v32 = vor.u32 %v4550_v25, %v3561_v24  ;;  %v4404_v24 = vld [vmem:[#allocation2 + $0xc] sm:$0xf]  ;;  %v2987_v25 = vld [vmem:[#allocation2 + $0x18] sm:$0xf0] }
  0x7c   :  { %1463 = vmatpush.bf16.msrb.mxu1 %v3050_v54  ;;  %1489 = vmatpush.bf16.msrb.mxu0 %v3306_v58  ;;  %v3610_v54 = vor.u32 %v4562_v37, %v3609_v36  ;;  %v4594_v58 = vld [vmem:[#allocation2 + $0x5f4] sm:$0xf0]  ;;  %v3689_v35 = vld [vmem:[#allocation2 + $0x588] sm:$0xf] }
  0x7d   :  { %v4582_v36 = vld [vmem:[#allocation2 + $0x594] sm:$0xf0]  ;;  %v3545_v37 = vld [vmem:[#allocation2 + $0x468] sm:$0xf] }
  0x7e   :  { %1501 = vmatpush.bf16.msra.mxu2 %v3450_v46  ;;  %1475 = vmatpush.bf16.msra.mxu3 %v3194_v50  ;;  %v3753_v46 = vld [vmem:[#allocation2 + $0x608] sm:$0xf]  ;;  %v4438_v50 = vld [vmem:[#allocation2 + $0x114] sm:$0xf0]  ;;  %v3690_v43 = vor.u32 %v4582_v36, %v3689_v35  ;;  %v4492_v35 = vld [vmem:[#allocation2 + $0x2cc] sm:$0xf]  ;;  %v2990_v36 = vor.u32 %v4404_v24, %v2987_v25 }
  0x7f   :  { %v3754_v63 = vor.u32 %v4598_v47, %v3753_v46  ;;  %v3114_v2 = vor.u32 %v4438_v50, %v3113_v40  ;;  %v4452_v40 = vld [vmem:[#allocation2 + $0x18c] sm:$0xf]  ;;  %v4578_v50 = vld [vmem:[#allocation2 + $0x574] sm:$0xf0] }
  0x80   :  { %1464 = vmatpush.bf16.msrb.mxu1 %v3034_v4  ;;  %1490 = vmatpush.bf16.msrb.mxu0 %v3290_v7  ;;  %v3738_v4 = vor.u32 %v4594_v58, %v3737_v56  ;;  %v3182_v47 = vor.u32 %v4452_v40, %v3179_v41  ;;  %v3115_v40 = vld [vmem:[#allocation2 + $0x118] sm:$0xf0]  ;;  %v4512_v24 = vld [vmem:[#allocation2 + $0x36c] sm:$0xf] }
  0x81   :  { %3760 = vmatmul.msk.bf16.vlgmr.msrb.gmra.mxu3 %vm1274_vm0, %v4915_v48 }
  0x82   :  { %1502 = vmatpush.bf16.msra.mxu2 %v3434_v62  ;;  %1476 = vmatpush.bf16.msra.mxu3 %v3178_v1  ;;  %v4558_v62 = vld [vmem:[#allocation2 + $0x4d4] sm:$0xf0]  ;;  %v3227_v1 = vld [vmem:[#allocation2 + $0x1f8] sm:$0xf0] }
  0x83   :  { %v3594_v7 = vor.u32 %v4558_v62, %v3593_v59  ;;  %v3230_v8 = vor.u32 %v4464_v0, %v3227_v1  ;;  %v4412_v59 = vld [vmem:[#allocation2 + $0x4c] sm:$0xf]  ;;  %v3530_v62 = vor.u32 %v4542_v52, %v3529_v51  ;;  %v3657_v0 = vld [vmem:[#allocation2 + $0x548] sm:$0xf]  ;;  %v4574_v1 = vld [vmem:[#allocation2 + $0x554] sm:$0xf0] }
  0x84   :  { %1465 = vmatpush.bf16.msrb.mxu1 %v3018_v17  ;;  %1491 = vmatpush.bf16.msrb.mxu0 %v3274_v20  ;;  %v3578_v20 = vor.u32 %v4554_v13, %v3577_v12  ;;  %v3641_v13 = vld [vmem:[#allocation2 + $0x528] sm:$0xf]  ;;  %v4556_v51 = vld [vmem:[#allocation2 + $0x4cc] sm:$0xf]  ;;  %v3595_v52 = vld [vmem:[#allocation2 + $0x4d8] sm:$0xf0] }
  0x86   :  { %1503 = vmatpush.bf16.msra.mxu2 %v3418_v11  ;;  %1477 = vmatpush.bf16.msra.mxu3 %v3162_v14  ;;  %v4590_v11 = vld [vmem:[#allocation2 + $0x5d4] sm:$0xf0]  ;;  %v4460_v14 = vld [vmem:[#allocation2 + $0x1cc] sm:$0xf] }
  0x87   :  { %v3722_v17 = vor.u32 %v4590_v11, %v3721_v10  ;;  %v3214_v21 = vor.u32 %v4460_v14, %v3211_v15  ;;  %v3003_v10 = vld [vmem:[#allocation2 + $0x38] sm:$0xf0]  ;;  %v4570_v14 = vld [vmem:[#allocation2 + $0x534] sm:$0xf0]  ;;  %v3497_v15 = vld [vmem:[#allocation2 + $0x408] sm:$0xf] }
  0x88   :  { %1466 = vmatpush.bf16.msrb.mxu1 %v3002_v29  ;;  %1492 = vmatpush.bf16.msrb.mxu0 %v3258_v33 }
  0x8a   :  { %1504 = vmatpush.bf16.msra.mxu2 %v3402_v23  ;;  %1478 = vmatpush.bf16.msra.mxu3 %v3146_v26  ;;  %v4586_v23 = vld [vmem:[#allocation2 + $0x5b4] sm:$0xf0]  ;;  %v4456_v26 = vld [vmem:[#allocation2 + $0x1ac] sm:$0xf] }
  0x8b   :  { %v3706_v29 = vor.u32 %v4586_v23, %v3705_v22  ;;  %v3198_v33 = vor.u32 %v4456_v26, %v3195_v27  ;;  %v3642_v22 = vor.u32 %v4570_v14, %v3641_v13  ;;  %v3625_v23 = vld [vmem:[#allocation2 + $0x508] sm:$0xf]  ;;  %v3435_v14 = vld [vmem:[#allocation2 + $0x398] sm:$0xf0] }
  0x8c   :  { %1467 = vmatpush.bf16.msrb.mxu1 %v2986_v49  ;;  %1493 = vmatpush.bf16.msrb.mxu0 %v3242_v55  ;;  %v3673_v49 = vld [vmem:[#allocation2 + $0x568] sm:$0xf]  ;;  %v3163_v55 = vld [vmem:[#allocation2 + $0x178] sm:$0xf0] }
  0x8d   :  { %v3674_v58 = vor.u32 %v4578_v50, %v3673_v49  ;;  %v3467_v50 = vld [vmem:[#allocation2 + $0x3d8] sm:$0xf0] }
  0x8e   :  { %1505 = vmatpush.bf16.msra.mxu2 %v3386_v38  ;;  %1479 = vmatpush.bf16.msra.mxu3 %v3130_v44  ;;  %v4546_v38 = vld [vmem:[#allocation2 + $0x474] sm:$0xf0]  ;;  %v4416_v44 = vld [vmem:[#allocation2 + $0x6c] sm:$0xf] }
  0x8f   :  { %1494 = vmatmul.bf16.vlgmr.msrb.gmra.mxu0 %v4900_v53  ;;  %1468 = vmatmul.bf16.vlgmr.msrb.gmra.mxu1 %v4902_v57  ;;  %v3546_v46 = vor.u32 %v4546_v38, %v3545_v37  ;;  %v3038_v56 = vor.u32 %v4416_v44, %v3035_v45  ;;  %v3339_v37 = vld [vmem:[#allocation2 + $0x2d8] sm:$0xf0]  ;;  %v4436_v38 = vld [vmem:[#allocation2 + $0x10c] sm:$0xf] }
  0x90   :  { %1512 = vmatpush.bf16.msra.mxu1 %v3610_v54  ;;  %1545 = vmatpush.bf16.msra.mxu0 %v3754_v63  ;;  %v4448_v54 = vld [vmem:[#allocation2 + $0x16c] sm:$0xf]  ;;  %v3118_v49 = vor.u32 %v4436_v38, %v3115_v40 }
  0x91   :  { %v3166_v63 = vor.u32 %v4448_v54, %v3163_v55  ;;  %v4488_v55 = vld [vmem:[#allocation2 + $0x2ac] sm:$0xf] }
  0x92   :  { %1506 = vmatpush.bf16.msra.mxu2 %v3370_v61  ;;  %1480 = vmatpush.bf16.msra.mxu3 %v3114_v2  ;;  %v3019_v61 = vld [vmem:[#allocation2 + $0x58] sm:$0xf0]  ;;  %v3513_v2 = vld [vmem:[#allocation2 + $0x428] sm:$0xf]  ;;  %v4508_v38 = vld [vmem:[#allocation2 + $0x34c] sm:$0xf] }
  0x93   :  { %v3022_v6 = vor.u32 %v4412_v59, %v3019_v61  ;;  %v3723_v59 = vld [vmem:[#allocation2 + $0x5d8] sm:$0xf0] }
  0x94   :  { %1513 = vmatpush.bf16.msra.mxu1 %v3594_v7  ;;  %1564 = vmatpush.bf16.msrb.mxu0 %v3230_v8  ;;  %v3658_v7 = vor.u32 %v4574_v1, %v3657_v0  ;;  %v4408_v8 = vld [vmem:[#allocation2 + $0x2c] sm:$0xf]  ;;  %v3451_v1 = vld [vmem:[#allocation2 + $0x3b8] sm:$0xf0] }
  0x95   :  { %1481 = vmatmul.bf16.vlgmr.msra.gmra.mxu3 %v4908_v9  ;;  %1507 = vmatmul.bf16.vlgmr.msra.gmra.mxu2 %v4904_v60  ;;  %v3006_v19 = vor.u32 %v4408_v8, %v3003_v10  ;;  %v3707_v8 = vld [vmem:[#allocation2 + $0x5b8] sm:$0xf0] }
  0x96   :  { %1551 = vmatpush.bf16.msrb.mxu2 %v3102_v3  ;;  %1525 = vmatpush.bf16.msrb.mxu3 %v3738_v4  ;;  %v4538_v3 = vld [vmem:[#allocation2 + $0x434] sm:$0xf0]  ;;  %v4444_v4 = vld [vmem:[#allocation2 + $0x14c] sm:$0xf] }
  0x97   :  { %v3514_v11 = vor.u32 %v4538_v3, %v3513_v2  ;;  %v3150_v12 = vor.u32 %v4444_v4, %v3147_v5  ;;  %v4552_v2 = vld [vmem:[#allocation2 + $0x4ac] sm:$0xf]  ;;  %v3579_v3 = vld [vmem:[#allocation2 + $0x4b8] sm:$0xf0] }
  0x98   :  { %1514 = vmatpush.bf16.msra.mxu1 %v3578_v20  ;;  %1565 = vmatpush.bf16.msrb.mxu0 %v3214_v21  ;;  %v4496_v20 = vld [vmem:[#allocation2 + $0x2ec] sm:$0xf]  ;;  %v3355_v21 = vld [vmem:[#allocation2 + $0x2f8] sm:$0xf0] }
  0x99   :  { %v3358_v31 = vor.u32 %v4496_v20, %v3355_v21  ;;  %v4484_v5 = vld [vmem:[#allocation2 + $0x28c] sm:$0xf]  ;;  %v3691_v21 = vld [vmem:[#allocation2 + $0x598] sm:$0xf0] }
  0x9a   :  { %1552 = vmatpush.bf16.msrb.mxu2 %v3086_v16  ;;  %1526 = vmatpush.bf16.msrb.mxu3 %v3722_v17  ;;  %v4534_v16 = vld [vmem:[#allocation2 + $0x414] sm:$0xf0]  ;;  %v4440_v17 = vld [vmem:[#allocation2 + $0x12c] sm:$0xf] }
  0x9b   :  { %v3498_v26 = vor.u32 %v4534_v16, %v3497_v15  ;;  %v3134_v27 = vor.u32 %v4440_v17, %v3131_v18  ;;  %v4548_v15 = vld [vmem:[#allocation2 + $0x48c] sm:$0xf]  ;;  %v3563_v16 = vld [vmem:[#allocation2 + $0x498] sm:$0xf0] }
  0x9c   :  { %1515 = vmatpush.bf16.msra.mxu1 %v3562_v32  ;;  %1566 = vmatpush.bf16.msrb.mxu0 %v3198_v33  ;;  %v4560_v32 = vld [vmem:[#allocation2 + $0x4ec] sm:$0xf]  ;;  %v3611_v33 = vld [vmem:[#allocation2 + $0x4f8] sm:$0xf0] }
  0x9d   :  { %v3614_v45 = vor.u32 %v4560_v32, %v3611_v33  ;;  %v4480_v18 = vld [vmem:[#allocation2 + $0x26c] sm:$0xf]  ;;  %v3675_v33 = vld [vmem:[#allocation2 + $0x578] sm:$0xf0] }
  0x9e   :  { %1553 = vmatpush.bf16.msrb.mxu2 %v3070_v28  ;;  %1527 = vmatpush.bf16.msrb.mxu3 %v3706_v29  ;;  %v4566_v28 = vld [vmem:[#allocation2 + $0x514] sm:$0xf0]  ;;  %v4528_v29 = vld [vmem:[#allocation2 + $0x3ec] sm:$0xf] }
  0x9f   :  { %3761 = vmatmul.msk.bf16.vlgmr.msra.gmra.mxu0 %vm1274_vm0, %v4915_v48  ;;  %v3626_v41 = vor.u32 %v4566_v28, %v3625_v23  ;;  %v3486_v44 = vor.u32 %v4528_v29, %v3483_v30  ;;  %v3566_v23 = vor.u32 %v4548_v15, %v3563_v16  ;;  %v3547_v28 = vld [vmem:[#allocation2 + $0x478] sm:$0xf0]  ;;  %v4476_v30 = vld [vmem:[#allocation2 + $0x24c] sm:$0xf] }
  0xa0   :  { %1516 = vmatpush.bf16.msra.mxu1 %v3546_v46  ;;  %1567 = vmatpush.bf16.msrb.mxu0 %v3182_v47  ;;  %v4524_v46 = vld [vmem:[#allocation2 + $0x3cc] sm:$0xf]  ;;  %v3342_v47 = vor.u32 %v4492_v35, %v3339_v37  ;;  %v3499_v15 = vld [vmem:[#allocation2 + $0x418] sm:$0xf0] }
  0xa1   :  { %v3470_v61 = vor.u32 %v4524_v46, %v3467_v50  ;;  %v4576_v32 = vld [vmem:[#allocation2 + $0x56c] sm:$0xf] }
  0xa2   :  { %1554 = vmatpush.bf16.msrb.mxu2 %v3054_v42  ;;  %1528 = vmatpush.bf16.msrb.mxu3 %v3690_v43  ;;  %v4592_v42 = vld [vmem:[#allocation2 + $0x5ec] sm:$0xf]  ;;  %v3739_v43 = vld [vmem:[#allocation2 + $0x5f8] sm:$0xf0] }
  0xa3   :  { %v3742_v54 = vor.u32 %v4592_v42, %v3739_v43  ;;  %v3403_v42 = vld [vmem:[#allocation2 + $0x358] sm:$0xf0]  ;;  %v4540_v43 = vld [vmem:[#allocation2 + $0x44c] sm:$0xf] }
  0xa4   :  { %1517 = vmatpush.bf16.msra.mxu1 %v3530_v62  ;;  %1568 = vmatpush.bf16.msrb.mxu0 %v3166_v63  ;;  %v3598_v62 = vor.u32 %v4556_v51, %v3595_v52  ;;  %v4520_v63 = vld [vmem:[#allocation2 + $0x3ac] sm:$0xf]  ;;  %v3659_v51 = vld [vmem:[#allocation2 + $0x558] sm:$0xf0]  ;;  %v3406_v52 = vor.u32 %v4508_v38, %v3403_v42  ;;  %v3845_v42 = vld [vmem:[#allocation5 + $0xa0] sm:$0xf] }
  0xa5   :  { %v3454_v10 = vor.u32 %v4520_v63, %v3451_v1  ;;  %v4472_v46 = vld [vmem:[#allocation2 + $0x22c] sm:$0xf] }
  0xa6   :  { %1555 = vmatpush.bf16.msrb.mxu2 %v3038_v56  ;;  %1529 = vmatpush.bf16.msrb.mxu3 %v3674_v58  ;;  %v3323_v56 = vld [vmem:[#allocation2 + $0x2b8] sm:$0xf0]  ;;  %v4588_v58 = vld [vmem:[#allocation2 + $0x5cc] sm:$0xf] }
  0xa7   :  { %v3326_v0 = vor.u32 %v4488_v55, %v3323_v56  ;;  %v3726_v4 = vor.u32 %v4588_v58, %v3723_v59  ;;  %v4572_v50 = vld [vmem:[#allocation2 + $0x54c] sm:$0xf]  ;;  %v3387_v58 = vld [vmem:[#allocation2 + $0x338] sm:$0xf0] }
  0xa8   :  { %1518 = vmatpush.bf16.msra.mxu1 %v3514_v11  ;;  %1569 = vmatpush.bf16.msrb.mxu0 %v3150_v12  ;;  %v3582_v11 = vor.u32 %v4552_v2, %v3579_v3  ;;  %v4516_v12 = vld [vmem:[#allocation2 + $0x38c] sm:$0xf]  ;;  %v3643_v3 = vld [vmem:[#allocation2 + $0x538] sm:$0xf0] }
  0xa9   :  { %v4504_v55 = vld [vmem:[#allocation2 + $0x32c] sm:$0xf] }
  0xaa   :  { %1556 = vmatpush.bf16.msrb.mxu2 %v3022_v6  ;;  %1530 = vmatpush.bf16.msrb.mxu3 %v3658_v7  ;;  %v3307_v6 = vld [vmem:[#allocation2 + $0x298] sm:$0xf0]  ;;  %v4584_v7 = vld [vmem:[#allocation2 + $0x5ac] sm:$0xf] }
  0xab   :  { %v3310_v13 = vor.u32 %v4484_v5, %v3307_v6  ;;  %v3710_v17 = vor.u32 %v4584_v7, %v3707_v8  ;;  %v4536_v59 = vld [vmem:[#allocation2 + $0x42c] sm:$0xf]  ;;  %v3755_v5 = vld [vmem:[#allocation2 + $0x618] sm:$0xf0]  ;;  %v4957_v6 = vld [vmem:[%s5149_s2] sm:$0xf]  ;;  %v3390_v8 = vor.u32 %v4504_v55, %v3387_v58 }
  0xac   :  { %1519 = vmatpush.bf16.msra.mxu1 %v3498_v26  ;;  %1570 = vmatpush.bf16.msrb.mxu0 %v3134_v27  ;;  %v3419_v26 = vld [vmem:[#allocation2 + $0x378] sm:$0xf0]  ;;  %v4544_v27 = vld [vmem:[#allocation2 + $0x46c] sm:$0xf] }
  0xad   :  { %v3550_v37 = vor.u32 %v4544_v27, %v3547_v28  ;;  %v4468_v63 = vld [vmem:[#allocation2 + $0x20c] sm:$0xf] }
  0xae   :  { %1557 = vmatpush.bf16.msrb.mxu2 %v3006_v19  ;;  %1531 = vmatpush.bf16.msrb.mxu3 %v3642_v22  ;;  %v3291_v19 = vld [vmem:[#allocation2 + $0x278] sm:$0xf0]  ;;  %v3438_v22 = vor.u32 %v4516_v12, %v3435_v14  ;;  %v4568_v1 = vld [vmem:[#allocation2 + $0x52c] sm:$0xf] }
  0xaf   :  { %1520 = vmatmul.bf16.vlgmr.msra.gmra.mxu1 %v4922_v34  ;;  %v3294_v25 = vor.u32 %v4480_v18, %v3291_v19  ;;  %v4532_v14 = vld [vmem:[#allocation2 + $0x40c] sm:$0xf]  ;;  %v3877_v18 = vld [vmem:[#allocation5 + $0xe0] sm:$0xf]  ;;  %v4629_v19 = vld [vmem:[#allocation5 + $0xec] sm:$0xf0] }
  0xb0   :  { %1577 = vmatpush.bf16.msrb.mxu1 %v3358_v31  ;;  %1571 = vmatpush.bf16.msrb.mxu0 %v3118_v49  ;;  %v4946_v20 = vpop.f32.mrf.mxu0  ;;  %v4948_v29 = vpop.f32.mrf.mxu1  ;;  %v3275_v31 = vld [vmem:[#allocation2 + $0x258] sm:$0xf0]  ;;  %v3502_v27 = vor.u32 %v4532_v14, %v3499_v15  ;;  %v3878_v28 = vor.u32 %v4629_v19, %v3877_v18  ;;  %v3909_v15 = vld [vmem:[#allocation5 + $0x120] sm:$0xf]  ;;  %v4601_v19 = vld [vmem:[#allocation5 + $0xc] sm:$0xf0] }
  0xb1   :  { %v3278_v40 = vor.u32 %v4476_v30, %v3275_v31  ;;  %v3861_v30 = vld [vmem:[#allocation5 + $0xc0] sm:$0xf]  ;;  %v4625_v31 = vld [vmem:[#allocation5 + $0xcc] sm:$0xf0] }
  0xb2   :  { %1558 = vmatpush.bf16.msrb.mxu2 %v2990_v36  ;;  %1532 = vmatpush.bf16.msrb.mxu3 %v3626_v41  ;;  %v3422_v36 = vor.u32 %v4512_v24, %v3419_v26  ;;  %v4661_v24 = vld [vmem:[#allocation5 + $0x1ec] sm:$0xf0]  ;;  %v3765_v18 = vld [vmem:[#allocation5] sm:$0xf] }
  0xb3   :  { %1572 = vmatmul.bf16.vlgmr.msrb.gmra.mxu0 %v4908_v9  ;;  %v4950_v35 = vpop.f32.mrf.mxu2 }
  0xb4   :  { %1578 = vmatpush.bf16.msrb.mxu1 %v3342_v47  ;;  %1616 = vmatpush.bf16.msra.mxu0 %v3742_v54  ;;  %v4952_v41 = vpop.f32.mrf.mxu3  ;;  %v3259_v47 = vld [vmem:[#allocation2 + $0x238] sm:$0xf0] }
  0xb5   :  { %1533 = vmatmul.bf16.vlgmr.msrb.gmra.mxu3 %v4924_v39  ;;  %1559 = vmatmul.bf16.vlgmr.msrb.gmra.mxu2 %v4902_v57  ;;  %v4580_v57 = vld [vmem:[#allocation2 + $0x58c] sm:$0xf]  ;;  %v3262_v56 = vor.u32 %v4472_v46, %v3259_v47  ;;  %v4653_v46 = vld [vmem:[#allocation5 + $0x1ac] sm:$0xf0] }
  0xb6   :  { %1590 = vmatpush.bf16.msra.mxu3 %v3486_v44  ;;  %1603 = vmatpush.bf16.msra.mxu2 %v3614_v45  ;;  %v3694_v9 = vor.u32 %v4580_v57, %v3691_v21  ;;  %v3531_v44 = vld [vmem:[#allocation2 + $0x458] sm:$0xf0]  ;;  %v3678_v45 = vor.u32 %v4576_v32, %v3675_v33  ;;  %v4564_v57 = vld [vmem:[#allocation2 + $0x50c] sm:$0xf]  ;;  %v3989_v33 = vld [vmem:[#allocation5 + $0x1c0] sm:$0xf] }
  0xb7   :  { %v3534_v54 = vor.u32 %v4540_v43, %v3531_v44  ;;  %v4621_v43 = vld [vmem:[#allocation5 + $0xac] sm:$0xf0] }
  0xb8   :  { %1579 = vmatpush.bf16.msrb.mxu1 %v3326_v0  ;;  %1617 = vmatpush.bf16.msra.mxu0 %v3726_v4  ;;  %v1289_v49 = vpop.f32.mrf.mxu0  ;;  %v3243_v0 = vld [vmem:[#allocation2 + $0x218] sm:$0xf0]  ;;  %v1302_v2 = vpop.f32.mrf.mxu1  ;;  %v4596_v4 = vld [vmem:[#allocation2 + $0x60c] sm:$0xf] }
  0xb9   :  { %v3246_v12 = vor.u32 %v4468_v63, %v3243_v0  ;;  %v3758_v21 = vor.u32 %v4596_v4, %v3755_v5  ;;  %v4617_v49 = vld [vmem:[#allocation5 + $0x8c] sm:$0xf0]  ;;  %v3925_v4 = vld [vmem:[#allocation5 + $0x140] sm:$0xf] }
  0xba   :  { %1591 = vmatpush.bf16.msra.mxu3 %v3470_v61  ;;  %1604 = vmatpush.bf16.msra.mxu2 %v3598_v62  ;;  %v3515_v61 = vld [vmem:[#allocation2 + $0x438] sm:$0xf0]  ;;  %v3662_v62 = vor.u32 %v4572_v50, %v3659_v51  ;;  %v4609_v2 = vld [vmem:[#allocation5 + $0x4c] sm:$0xf0] }
  0xbb   :  { %v1315_v7 = vpop.f32.mrf.mxu2  ;;  %v4641_v5 = vld [vmem:[#allocation5 + $0x14c] sm:$0xf0] }
  0xbc   :  { %1580 = vmatpush.bf16.msrb.mxu1 %v3310_v13  ;;  %1618 = vmatpush.bf16.msra.mxu0 %v3710_v17  ;;  %v3371_v13 = vld [vmem:[#allocation2 + $0x318] sm:$0xf0]  ;;  %v1328_v16 = vpop.f32.mrf.mxu3  ;;  %v3646_v17 = vor.u32 %v4568_v1, %v3643_v3  ;;  %v3797_v1 = vld [vmem:[#allocation5 + $0x40] sm:$0xf]  ;;  %v3926_v14 = vor.u32 %v4641_v5, %v3925_v4  ;;  %v4677_v4 = vld [vmem:[#allocation5 + $0x26c] sm:$0xf0] }
  0xbd   :  { %v4637_v16 = vld [vmem:[#allocation5 + $0x12c] sm:$0xf0]  ;;  %v263_v5 = vperm.slane %v4957_v6, 1 }
  0xbe   :  { %1592 = vmatpush.bf16.msra.mxu3 %v3454_v10  ;;  %1605 = vmatpush.bf16.msra.mxu2 %v3582_v11  ;;  %v3518_v10 = vor.u32 %v4536_v59, %v3515_v61  ;;  %v4500_v11 = vld [vmem:[#allocation2 + $0x30c] sm:$0xf]  ;;  %v4613_v59 = vld [vmem:[#allocation5 + $0x6c] sm:$0xf0]  ;;  %v3941_v61 = vld [vmem:[#allocation5 + $0x160] sm:$0xf] }
  0xbf   :  { %v3374_v26 = vor.u32 %v4500_v11, %v3371_v13  ;;  %v4605_v13 = vld [vmem:[#allocation5 + $0x2c] sm:$0xf0] }
  0xc0   :  { %1581 = vmatpush.bf16.msrb.mxu1 %v3294_v25  ;;  %1619 = vmatpush.bf16.msra.mxu0 %v3694_v9  ;;  %v262_v25 = vperm.slane %v4957_v6, 0 }
  0xc2   :  { %1593 = vmatpush.bf16.msra.mxu3 %v3438_v22  ;;  %1606 = vmatpush.bf16.msra.mxu2 %v3566_v23  ;;  %v3627_v22 = vld [vmem:[#allocation2 + $0x518] sm:$0xf0]  ;;  %v4005_v23 = vld [vmem:[#allocation5 + $0x1e0] sm:$0xf] }
  0xc3   :  { %v3630_v9 = vor.u32 %v4564_v57, %v3627_v22  ;;  %v4006_v32 = vor.u32 %v4661_v24, %v4005_v23  ;;  %v4133_v22 = vld [vmem:[#allocation5 + $0x2e0] sm:$0xf]  ;;  %v4693_v23 = vld [vmem:[#allocation5 + $0x2ec] sm:$0xf0] }
  0xc4   :  { %1582 = vmatpush.bf16.msrb.mxu1 %v3278_v40  ;;  %1620 = vmatpush.bf16.msra.mxu0 %v3678_v45  ;;  %v4962_v38 = vpop.f32.mrf.mxu2  ;;  %v3862_v40 = vor.u32 %v4625_v31, %v3861_v30  ;;  %v3973_v45 = vld [vmem:[#allocation5 + $0x1a0] sm:$0xf]  ;;  %v4007_v30 = vld [vmem:[#allocation5 + $0x1f0] sm:$0xf0]  ;;  %v3766_v31 = vor.u32 %v4601_v19, %v3765_v18  ;;  %v4607_v19 = vld [vmem:[#allocation5 + $0x44] sm:$0xf] }
  0xc5   :  { %v3974_v50 = vor.u32 %v4653_v46, %v3973_v45  ;;  %v4655_v46 = vld [vmem:[#allocation5 + $0x1c4] sm:$0xf] }
  0xc6   :  { %1594 = vmatpush.bf16.msra.mxu3 %v3422_v36  ;;  %1607 = vmatpush.bf16.msra.mxu2 %v3550_v37  ;;  %v4657_v36 = vld [vmem:[#allocation5 + $0x1cc] sm:$0xf0]  ;;  %v1288_v37 = vadd.f32 %v4946_v20, %v262_v25  ;;  %v3829_v20 = vld [vmem:[#allocation5 + $0x80] sm:$0xf]  ;;  %v3879_v25 = vld [vmem:[#allocation5 + $0xf0] sm:$0xf0] }
  0xc7   :  { %v3990_v44 = vor.u32 %v4657_v36, %v3989_v33  ;;  %v3830_v58 = vor.u32 %v4617_v49, %v3829_v20  ;;  %v4101_v49 = vld [vmem:[#allocation5 + $0x2a0] sm:$0xf] }
  0xc8   :  { %1583 = vmatpush.bf16.msrb.mxu1 %v3262_v56  ;;  %1621 = vmatpush.bf16.msra.mxu0 %v3662_v62  ;;  %v1301_v47 = vadd.f32 %v4948_v29, %v1288_v37  ;;  %v3813_v29 = vld [vmem:[#allocation5 + $0x60] sm:$0xf] }
  0xc9   :  { %v3814_v63 = vor.u32 %v4613_v59, %v3813_v29  ;;  %v4085_v29 = vld [vmem:[#allocation5 + $0x280] sm:$0xf]  ;;  %v4681_v59 = vld [vmem:[#allocation5 + $0x28c] sm:$0xf0] }
  0xca   :  { %1595 = vmatpush.bf16.msra.mxu3 %v3406_v52  ;;  %1608 = vmatpush.bf16.msra.mxu2 %v3534_v54  ;;  %v3957_v52 = vld [vmem:[#allocation5 + $0x180] sm:$0xf]  ;;  %v4649_v54 = vld [vmem:[#allocation5 + $0x18c] sm:$0xf0]  ;;  %v1314_v55 = vadd.f32 %v4950_v35, %v1301_v47  ;;  %v3991_v47 = vld [vmem:[#allocation5 + $0x1d0] sm:$0xf0] }
  0xcc   :  { %1584 = vmatpush.bf16.msrb.mxu1 %v3246_v12  ;;  %1622 = vmatpush.bf16.msra.mxu0 %v3646_v17  ;;  %v1339_v51 = vpop.f32.mrf.mxu0  ;;  %v1367_v56 = vpop.f32.mrf.mxu2  ;;  %v1327_v62 = vadd.f32 %v4952_v41, %v1314_v55  ;;  %v3781_v12 = vld [vmem:[#allocation5 + $0x20] sm:$0xf] }
  0xcd   :  { %v3782_v17 = vor.u32 %v4605_v13, %v3781_v12  ;;  %v3975_v56 = vld [vmem:[#allocation5 + $0x1b0] sm:$0xf0]  ;;  %v4643_v13 = vld [vmem:[#allocation5 + $0x164] sm:$0xf] }
  0xce   :  { %1596 = vmatpush.bf16.msra.mxu3 %v3390_v8  ;;  %1609 = vmatpush.bf16.msra.mxu2 %v3518_v10  ;;  %v1340_v0 = vadd.f32 %v1339_v51, %v1327_v62  ;;  %v3798_v10 = vor.u32 %v4609_v2, %v3797_v1  ;;  %v4619_v51 = vld [vmem:[#allocation5 + $0xa4] sm:$0xf]  ;;  %v4086_v62 = vor.u32 %v4681_v59, %v4085_v29 }
  0xcf   :  { %1585 = vmatmul.bf16.vlgmr.msrb.gmra.mxu1 %v4900_v53  ;;  %v3846_v53 = vor.u32 %v4621_v43, %v3845_v42  ;;  %v4623_v42 = vld [vmem:[#allocation5 + $0xc4] sm:$0xf]  ;;  %v3863_v43 = vld [vmem:[#allocation5 + $0xd0] sm:$0xf0] }
  0xd0   :  { %1636 = vmatpush.bf16.msra.mxu1 %v3758_v21  ;;  %1623 = vmatpush.bf16.msra.mxu0 %v3630_v9  ;;  %v3910_v21 = vor.u32 %v4637_v16, %v3909_v15  ;;  %v4659_v9 = vld [vmem:[#allocation5 + $0x1e4] sm:$0xf]  ;;  %v3866_v20 = vor.u32 %v4623_v42, %v3863_v43  ;;  %v4053_v16 = vld [vmem:[#allocation5 + $0x240] sm:$0xf] }
  0xd1   :  { %v4599_v42 = vld [vmem:[#allocation5 + $0x4] sm:$0xf] }
  0xd2   :  { %1597 = vmatpush.bf16.msra.mxu3 %v3374_v26  ;;  %1610 = vmatpush.bf16.msra.mxu2 %v3502_v27  ;;  %v3893_v26 = vld [vmem:[#allocation5 + $0x100] sm:$0xf]  ;;  %v4633_v27 = vld [vmem:[#allocation5 + $0x10c] sm:$0xf0] }
  0xd3   :  { %1624 = vmatmul.bf16.vlgmr.msra.gmra.mxu0 %v4924_v39  ;;  %v4645_v39 = vld [vmem:[#allocation5 + $0x16c] sm:$0xf0]  ;;  %v3894_v37 = vor.u32 %v4633_v27, %v3893_v26 }
  0xd4   :  { %2441 = vmatpush.bf16.msrb.mxu1 %v4006_v32  ;;  %v3942_v3 = vor.u32 %v4645_v39, %v3941_v61  ;;  %v4970_v35 = vpop.f32.mrf.mxu3  ;;  %v1341_v7 = vpop.f32.mrf.mxu0  ;;  %v3831_v61 = vld [vmem:[#allocation5 + $0x90] sm:$0xf0] }
  0xd5   :  { %1598 = vmatmul.bf16.vlgmr.msra.gmra.mxu3 %v4904_v60  ;;  %1611 = vmatmul.bf16.vlgmr.msra.gmra.mxu2 %v4922_v34  ;;  %v1352_v60 = vpop.f32.mrf.mxu1  ;;  %v3958_v34 = vor.u32 %v4649_v54, %v3957_v52  ;;  %v3847_v52 = vld [vmem:[#allocation5 + $0xb0] sm:$0xf0]  ;;  %v3994_v54 = vor.u32 %v4655_v46, %v3991_v47  ;;  %v1379_v18 = vadd.f32 %v4970_v35, %v263_v5  ;;  %v4665_v46 = vld [vmem:[#allocation5 + $0x20c] sm:$0xf0]  ;;  %v3885_v47 = vld [vmem:[#allocation5 + $0xe8] sm:$0xf] }
  0xd6   :  { %2428 = vmatpush.bf16.msrb.mxu3 %v3878_v28  ;;  %v1353_v41 = vadd.f32 %v1352_v60, %v1340_v0  ;;  %v4134_v28 = vor.u32 %v4693_v23, %v4133_v22  ;;  %v4651_v60 = vld [vmem:[#allocation5 + $0x1a4] sm:$0xf]  ;;  %v3959_v0 = vld [vmem:[#allocation5 + $0x190] sm:$0xf0] }
  0xd7   :  { %v3978_v39 = vor.u32 %v4651_v60, %v3975_v56  ;;  %v4639_v23 = vld [vmem:[#allocation5 + $0x144] sm:$0xf] }
  0xd8   :  { %2442 = vmatpush.bf16.msrb.mxu1 %v3990_v44  ;;  %v4974_v11 = vpop.f32.mrf.mxu2  ;;  %v1366_v57 = vadd.f32 %v4962_v38, %v1353_v41  ;;  %2454 = vmatpush.bf16.msrb.mxu2 %v4134_v28  ;;  %v4117_v38 = vld [vmem:[#allocation5 + $0x2c0] sm:$0xf]  ;;  %v4010_v44 = vor.u32 %v4659_v9, %v4007_v30  ;;  %v4669_v9 = vld [vmem:[#allocation5 + $0x22c] sm:$0xf0] }
  0xd9   :  { %v4037_v28 = vld [vmem:[#allocation5 + $0x220] sm:$0xf]  ;;  %v1392_v30 = vadd.f32 %v4974_v11, %v1379_v18  ;;  %v4013_v18 = vld [vmem:[#allocation5 + $0x1e8] sm:$0xf] }
  0xda   :  { %2429 = vmatpush.bf16.msrb.mxu3 %v3862_v40  ;;  %v1642_v33 = vmax.f32 %v1366_v57, 0.0  ;;  %v4689_v40 = vld [vmem:[#allocation5 + $0x2cc] sm:$0xf0]  ;;  %v3799_v57 = vld [vmem:[#allocation5 + $0x50] sm:$0xf0] }
  0xdb   :  { %v4118_v45 = vor.u32 %v4689_v40, %v4117_v38  ;;  %v3802_v27 = vor.u32 %v4607_v19, %v3799_v57  ;;  %v3911_v38 = vld [vmem:[#allocation5 + $0x130] sm:$0xf0]  ;;  %v4662_v19 = vld [vmem:[#allocation5 + $0x1f4] sm:$0xf0] }
  0xdc   :  { %2443 = vmatpush.bf16.msrb.mxu1 %v3974_v50  ;;  %v1380_v24 = vpop.f32.mrf.mxu3  ;;  %v4685_v50 = vld [vmem:[#allocation5 + $0x2ac] sm:$0xf0] }
  0xdd   :  { %v1354_v8 = vpop.f32.mrf.mxu1  ;;  %2455 = vmatpush.bf16.msrb.mxu2 %v4118_v45  ;;  %v4102_v55 = vor.u32 %v4685_v50, %v4101_v49  ;;  %v3927_v24 = vld [vmem:[#allocation5 + $0x150] sm:$0xf0]  ;;  %v4021_v45 = vld [vmem:[#allocation5 + $0x200] sm:$0xf]  ;;  %v4691_v49 = vld [vmem:[#allocation5 + $0x2e4] sm:$0xf] }
  0xde   :  { %2430 = vmatpush.bf16.msrb.mxu3 %v3846_v53  ;;  %v4977_v53 = vpack.c.bf16 %v1642_v33, %v1642_v33  ;;  %v4611_v8 = vld [vmem:[#allocation5 + $0x64] sm:$0xf]  ;;  %v3930_v35 = vor.u32 %v4639_v23, %v3927_v24  ;;  %v4022_v11 = vor.u32 %v4665_v46, %v4021_v45  ;;  %v4135_v50 = vld [vmem:[#allocation5 + $0x2f0] sm:$0xf0]  ;;  %v4618_v23 = vld [vmem:[#allocation5 + $0x94] sm:$0xf0] }
  0xdf   :  { %3762 = vmatmul.msk.bf16.vlgmr.msra.gmra.mxu1 %vm1274_vm0, %v4915_v48  ;;  %v4627_v48 = vld [vmem:[#allocation5 + $0xe4] sm:$0xf]  ;;  %v4138_v60 = vor.u32 %v4691_v49, %v4135_v50  ;;  %v4213_v46 = vld [vmem:[#allocation5 + $0x380] sm:$0xf] }
  0xe0   :  { %2444 = vmatpush.bf16.msrb.mxu1 %v3958_v34  ;;  %v1393_v32 = vpop.f32.mrf.mxu2  ;;  %v3882_v36 = vor.u32 %v4627_v48, %v3879_v25  ;;  %v4615_v34 = vld [vmem:[#allocation5 + $0x84] sm:$0xf] }
  0xe1   :  { %2456 = vmatpush.bf16.msrb.mxu2 %v4102_v55  ;;  %v3834_v2 = vor.u32 %v4615_v34, %v3831_v61  ;;  %v3783_v32 = vld [vmem:[#allocation5 + $0x30] sm:$0xf0]  ;;  %v3869_v61 = vld [vmem:[#allocation5 + $0xc8] sm:$0xf]  ;;  %v4679_v24 = vld [vmem:[#allocation5 + $0x284] sm:$0xf] }
  0xe2   :  { %2431 = vmatpush.bf16.msrb.mxu3 %v3830_v58  ;;  %v3850_v58 = vor.u32 %v4619_v51, %v3847_v52  ;;  %v4630_v52 = vld [vmem:[#allocation5 + $0xf4] sm:$0xf0]  ;;  %v3895_v55 = vld [vmem:[#allocation5 + $0x110] sm:$0xf0] }
  0xe3   :  { %v3886_v34 = vor.u32 %v4630_v52, %v3885_v47  ;;  %v4713_v47 = vld [vmem:[#allocation5 + $0x38c] sm:$0xf0]  ;;  %v3805_v52 = vld [vmem:[#allocation5 + $0x48] sm:$0xf] }
  0xe4   :  { %2445 = vmatpush.bf16.msrb.mxu1 %v3942_v3  ;;  %v4069_v3 = vld [vmem:[#allocation5 + $0x260] sm:$0xf]  ;;  %v4214_v49 = vor.u32 %v4713_v47, %v4213_v46  ;;  %v4723_v46 = vld [vmem:[#allocation5 + $0x3e4] sm:$0xf]  ;;  %v4263_v47 = vld [vmem:[#allocation5 + $0x3f0] sm:$0xf0] }
  0xe5   :  { %2457 = vmatpush.bf16.msrb.mxu2 %v4086_v62  ;;  %v4070_v12 = vor.u32 %v4677_v4, %v4069_v3  ;;  %v4687_v62 = vld [vmem:[#allocation5 + $0x2c4] sm:$0xf]  ;;  %v4725_v3 = vld [vmem:[#allocation5 + $0x3ec] sm:$0xf0] }
  0xe6   :  { %2432 = vmatpush.bf16.msrb.mxu3 %v3814_v63  ;;  %v4647_v63 = vld [vmem:[#allocation5 + $0x184] sm:$0xf] }
  0xe7   :  { %v3962_v41 = vor.u32 %v4647_v63, %v3959_v0  ;;  %v4119_v63 = vld [vmem:[#allocation5 + $0x2d0] sm:$0xf0]  ;;  %v4626_v0 = vld [vmem:[#allocation5 + $0xd4] sm:$0xf0] }
  0xe8   :  { %2446 = vmatpush.bf16.msrb.mxu1 %v3926_v14  ;;  %v3943_v14 = vld [vmem:[#allocation5 + $0x170] sm:$0xf0] }
  0xe9   :  { %2458 = vmatpush.bf16.msrb.mxu2 %v4070_v12  ;;  %v3946_v48 = vor.u32 %v4643_v13, %v3943_v14  ;;  %v4622_v13 = vld [vmem:[#allocation5 + $0xb4] sm:$0xf0] }
  0xea   :  { %2433 = vmatpush.bf16.msrb.mxu3 %v3798_v10  ;;  %v3815_v10 = vld [vmem:[#allocation5 + $0x70] sm:$0xf0] }
  0xeb   :  { %v3818_v15 = vor.u32 %v4611_v8, %v3815_v10  ;;  %v3853_v8 = vld [vmem:[#allocation5 + $0xa8] sm:$0xf]  ;;  %v4683_v10 = vld [vmem:[#allocation5 + $0x2a4] sm:$0xf] }
  0xec   :  { %2447 = vmatpush.bf16.msrb.mxu1 %v3910_v21  ;;  %v1404_v1 = vpop.f32.mrf.mxu0  ;;  %v1417_v7 = vpop.f32.mrf.mxu1 }
  0xed   :  { %v1405_v40 = vadd.f32 %v1404_v1, %v1392_v30  ;;  %v4122_v1 = vor.u32 %v4687_v62, %v4119_v63  ;;  %v3997_v30 = vld [vmem:[#allocation5 + $0x1c8] sm:$0xf] }
  0xee   :  { %2434 = vmatpush.bf16.msrb.mxu3 %v3782_v17  ;;  %v4673_v17 = vld [vmem:[#allocation5 + $0x24c] sm:$0xf0]  ;;  %v3789_v63 = vld [vmem:[#allocation5 + $0x28] sm:$0xf] }
  0xef   :  { %v4054_v21 = vor.u32 %v4673_v17, %v4053_v16  ;;  %v1418_v56 = vadd.f32 %v1417_v7, %v1405_v40  ;;  %v3870_v7 = vor.u32 %v4626_v0, %v3869_v61  ;;  %v4721_v16 = vld [vmem:[#allocation5 + $0x3cc] sm:$0xf0]  ;;  %v4650_v61 = vld [vmem:[#allocation5 + $0x194] sm:$0xf0]  ;;  %v4667_v0 = vld [vmem:[#allocation5 + $0x224] sm:$0xf] }
  0xf0   :  { %2448 = vmatpush.bf16.msrb.mxu1 %v3894_v37  ;;  %v4635_v37 = vld [vmem:[#allocation5 + $0x124] sm:$0xf] }
  0xf1   :  { %2459 = vmatpush.bf16.msrb.mxu2 %v4054_v21 }
  0xf2   :  { %2435 = vmatpush.bf16.msrb.mxu3 %v3766_v31  ;;  %v4603_v31 = vld [vmem:[#allocation5 + $0x24] sm:$0xf] }
  0xf3   :  { %v3786_v43 = vor.u32 %v4603_v31, %v3783_v32  ;;  %v4658_v31 = vld [vmem:[#allocation5 + $0x1d4] sm:$0xf0] }
  0xf4   :  { %2493 = vmatpush.bf16.msra.mxu1 %v4010_v44  ;;  %v1430_v22 = vpop.f32.mrf.mxu3  ;;  %v1406_v25 = vpop.f32.mrf.mxu0  ;;  %v3767_v44 = vld [vmem:[#allocation5 + $0x10] sm:$0xf0] }
  0xf5   :  { %2436 = vmatmul.bf16.vlgmr.msrb.gmra.mxu3 %v4977_v53  ;;  %v1419_v33 = vpop.f32.mrf.mxu1  ;;  %v1431_v59 = vadd.f32 %v1430_v22, %v1418_v56  ;;  %v3854_v22 = vor.u32 %v4622_v13, %v3853_v8  ;;  %v4014_v25 = vor.u32 %v4662_v19, %v4013_v18  ;;  %v4610_v56 = vld [vmem:[#allocation5 + $0x54] sm:$0xf0]  ;;  %v4181_v8 = vld [vmem:[#allocation5 + $0x340] sm:$0xf]  ;;  %v4663_v19 = vld [vmem:[#allocation5 + $0x204] sm:$0xf] }
  0xf6   :  { %2480 = vmatpush.bf16.msra.mxu3 %v3882_v36  ;;  %v4038_v36 = vor.u32 %v4669_v9, %v4037_v28  ;;  %v4717_v28 = vld [vmem:[#allocation5 + $0x3ac] sm:$0xf0]  ;;  %v3806_v62 = vor.u32 %v4610_v56, %v3805_v52  ;;  %v4602_v18 = vld [vmem:[#allocation5 + $0x14] sm:$0xf0]  ;;  %v3855_v56 = vld [vmem:[#allocation5 + $0xb8] sm:$0xf0] }
  0xf8   :  { %2494 = vmatpush.bf16.msra.mxu1 %v3994_v54  ;;  %v1443_v26 = vpop.f32.mrf.mxu2  ;;  %2460 = vmatpush.bf16.msrb.mxu2 %v4038_v36  ;;  %v4631_v54 = vld [vmem:[#allocation5 + $0x104] sm:$0xf]  ;;  %v3821_v36 = vld [vmem:[#allocation5 + $0x68] sm:$0xf] }
  0xf9   :  { %v1444_v5 = vadd.f32 %v1443_v26, %v1431_v59  ;;  %v4087_v26 = vld [vmem:[#allocation5 + $0x290] sm:$0xf0]  ;;  %v4709_v59 = vld [vmem:[#allocation5 + $0x36c] sm:$0xf0] }
  0xfa   :  { %2481 = vmatpush.bf16.msra.mxu3 %v3866_v20  ;;  %v3914_v20 = vor.u32 %v4635_v37, %v3911_v38  ;;  %v4090_v32 = vor.u32 %v4679_v24, %v4087_v26  ;;  %v4675_v37 = vld [vmem:[#allocation5 + $0x264] sm:$0xf]  ;;  %v4071_v38 = vld [vmem:[#allocation5 + $0x270] sm:$0xf0]  ;;  %v4701_v24 = vld [vmem:[#allocation5 + $0x32c] sm:$0xf0] }
  0xfb   :  { %v4074_v45 = vor.u32 %v4675_v37, %v4071_v38  ;;  %v4628_v26 = vld [vmem:[#allocation5 + $0xec] sm:$0xf] }
  0xfc   :  { %2495 = vmatpush.bf16.msra.mxu1 %v3978_v39  ;;  %v1432_v51 = vpop.f32.mrf.mxu3  ;;  %2461 = vmatpush.bf16.msrb.mxu2 %v4022_v11  ;;  %v3898_v39 = vor.u32 %v4631_v54, %v3895_v55  ;;  %v4654_v11 = vld [vmem:[#allocation5 + $0x1b4] sm:$0xf0]  ;;  %v4671_v54 = vld [vmem:[#allocation5 + $0x244] sm:$0xf]  ;;  %v4055_v55 = vld [vmem:[#allocation5 + $0x250] sm:$0xf0] }
  0xfe   :  { %2482 = vmatpush.bf16.msra.mxu3 %v3850_v58  ;;  %v3770_v58 = vor.u32 %v4599_v42, %v3767_v44  ;;  %v4614_v44 = vld [vmem:[#allocation5 + $0x74] sm:$0xf0] }
  0xff   :  { %v3822_v51 = vor.u32 %v4614_v44, %v3821_v36  ;;  %v4624_v36 = vld [vmem:[#allocation5 + $0xcc] sm:$0xf]  ;;  %v3871_v44 = vld [vmem:[#allocation5 + $0xd8] sm:$0xf0] }
 0x100   :  { %2496 = vmatpush.bf16.msra.mxu1 %v3962_v41  ;;  %v1445_v29 = vpop.f32.mrf.mxu2  ;;  %2506 = vmatpush.bf16.msra.mxu2 %v4138_v60  ;;  %v4103_v41 = vld [vmem:[#allocation5 + $0x2b0] sm:$0xf0]  ;;  %v3874_v52 = vor.u32 %v4624_v36, %v3871_v44  ;;  %v3791_v44 = vld [vmem:[#allocation5 + $0x38] sm:$0xf0] }
 0x101   :  { %v4106_v14 = vor.u32 %v4683_v10, %v4103_v41  ;;  %v4197_v29 = vld [vmem:[#allocation5 + $0x360] sm:$0xf]  ;;  %v4705_v10 = vld [vmem:[#allocation5 + $0x34c] sm:$0xf0]  ;;  %v3949_v41 = vld [vmem:[#allocation5 + $0x168] sm:$0xf] }
 0x102   :  { %2483 = vmatpush.bf16.msra.mxu3 %v3834_v2  ;;  %v4261_v2 = vld [vmem:[#allocation5 + $0x3e0] sm:$0xf]  ;;  %v4182_v13 = vor.u32 %v4705_v10, %v4181_v8  ;;  %v4656_v10 = vld [vmem:[#allocation5 + $0x1cc] sm:$0xf] }
 0x103   :  { %v4262_v4 = vor.u32 %v4725_v3, %v4261_v2 }
 0x104   :  { %2497 = vmatpush.bf16.msra.mxu1 %v3946_v48  ;;  %2507 = vmatpush.bf16.msra.mxu2 %v4122_v1  ;;  %v1456_v12 = vpop.f32.mrf.mxu3  ;;  %v3837_v48 = vld [vmem:[#allocation5 + $0x88] sm:$0xf]  ;;  %v4039_v1 = vld [vmem:[#allocation5 + $0x230] sm:$0xf0] }
 0x105   :  { %2467 = vmatpush.bf16.msrb.mxu0 %v4262_v4  ;;  %v1457_v17 = vadd.f32 %v1456_v12, %v1444_v5  ;;  %v3838_v33 = vor.u32 %v4618_v23, %v3837_v48  ;;  %v4606_v5 = vld [vmem:[#allocation5 + $0x34] sm:$0xf0]  ;;  %v4165_v23 = vld [vmem:[#allocation5 + $0x320] sm:$0xf] }
 0x106   :  { %2484 = vmatpush.bf16.msra.mxu3 %v3818_v15  ;;  %v4245_v15 = vld [vmem:[#allocation5 + $0x3c0] sm:$0xf]  ;;  %v4646_v12 = vld [vmem:[#allocation5 + $0x174] sm:$0xf0] }
 0x107   :  { %v4246_v57 = vor.u32 %v4721_v16, %v4245_v15  ;;  %v1643_v21 = vmax.f32 %v1457_v17, 0.0  ;;  %v3773_v15 = vld [vmem:[#allocation5 + $0x8] sm:$0xf]  ;;  %v3790_v17 = vor.u32 %v4606_v5, %v3789_v63  ;;  %v3950_v48 = vor.u32 %v4646_v12, %v3949_v41  ;;  %v4715_v5 = vld [vmem:[#allocation5 + $0x3a4] sm:$0xf] }
 0x108   :  { %2498 = vmatpush.bf16.msra.mxu1 %v3930_v35  ;;  %2508 = vmatpush.bf16.msra.mxu2 %v4106_v14 }
 0x109   :  { %2468 = vmatpush.bf16.msrb.mxu0 %v4246_v57  ;;  %v4984_v9 = vpack.c.bf16 %v1643_v21, %v1643_v21  ;;  %v4023_v57 = vld [vmem:[#allocation5 + $0x210] sm:$0xf0]  ;;  %v3933_v21 = vld [vmem:[#allocation5 + $0x148] sm:$0xf] }
 0x10a   :  { %2485 = vmatpush.bf16.msra.mxu3 %v3802_v27  ;;  %v4229_v27 = vld [vmem:[#allocation5 + $0x3a0] sm:$0xf] }
 0x10b   :  { %v4230_v35 = vor.u32 %v4717_v28, %v4229_v27  ;;  %2449 = vmatmul.bf16.vlgmr.msrb.gmra.mxu1 %v4984_v9  ;;  %v3887_v27 = vld [vmem:[#allocation5 + $0xf8] sm:$0xf0]  ;;  %v4166_v28 = vor.u32 %v4701_v24, %v4165_v23  ;;  %v4608_v23 = vld [vmem:[#allocation5 + $0x4c] sm:$0xf] }
 0x10c   :  { %2499 = vmatpush.bf16.msra.mxu1 %v3914_v20  ;;  %v1458_v40 = vpop.f32.mrf.mxu3  ;;  %v4987_v42 = vpop.f32.mrf.mxu0  ;;  %2509 = vmatpush.bf16.msra.mxu2 %v4090_v32  ;;  %v3981_v20 = vld [vmem:[#allocation5 + $0x1a8] sm:$0xf]  ;;  %v4638_v32 = vld [vmem:[#allocation5 + $0x134] sm:$0xf0] }
 0x10d   :  { %2469 = vmatpush.bf16.msrb.mxu0 %v4230_v35  ;;  %v4989_v50 = vpop.f32.mrf.mxu1  ;;  %v3982_v60 = vor.u32 %v4654_v11, %v3981_v20  ;;  %v4149_v40 = vld [vmem:[#allocation5 + $0x300] sm:$0xf]  ;;  %v264_v20 = vperm.slane %v4957_v6, 2 }
 0x10e   :  { %2486 = vmatpush.bf16.msra.mxu3 %v3786_v43  ;;  %v3998_v43 = vor.u32 %v4658_v31, %v3997_v30  ;;  %v3774_v30 = vor.u32 %v4602_v18, %v3773_v15  ;;  %v3917_v31 = vld [vmem:[#allocation5 + $0x128] sm:$0xf]  ;;  %v4612_v15 = vld [vmem:[#allocation5 + $0x6c] sm:$0xf]  ;;  %v4711_v18 = vld [vmem:[#allocation5 + $0x384] sm:$0xf] }
 0x110   :  { %2500 = vmatpush.bf16.msra.mxu1 %v3898_v39  ;;  %2510 = vmatpush.bf16.msra.mxu2 %v4074_v45  ;;  %v4198_v39 = vor.u32 %v4709_v59, %v4197_v29  ;;  %v4247_v29 = vld [vmem:[#allocation5 + $0x3d0] sm:$0xf0]  ;;  %v1470_v59 = vadd.f32 %v4989_v50, %v264_v20  ;;  %v3999_v50 = vld [vmem:[#allocation5 + $0x1d8] sm:$0xf0]  ;;  %v4644_v20 = vld [vmem:[#allocation5 + $0x16c] sm:$0xf] }
 0x111   :  { %2470 = vmatpush.bf16.msrb.mxu0 %v4214_v49  ;;  %v4266_v49 = vor.u32 %v4723_v46, %v4263_v47  ;;  %v4183_v46 = vld [vmem:[#allocation5 + $0x350] sm:$0xf0] }
 0x112   :  { %2487 = vmatpush.bf16.msra.mxu3 %v3770_v58  ;;  %v4058_v58 = vor.u32 %v4671_v54, %v4055_v55  ;;  %v3901_v54 = vld [vmem:[#allocation5 + $0x108] sm:$0xf]  ;;  %v4634_v55 = vld [vmem:[#allocation5 + $0x114] sm:$0xf0] }
 0x114   :  { %2545 = vmatpush.bf16.msrb.mxu1 %v4014_v25  ;;  %v1497_v3 = vpop.f32.mrf.mxu0  ;;  %2511 = vmatpush.bf16.msra.mxu2 %v4058_v58  ;;  %v4642_v25 = vld [vmem:[#allocation5 + $0x154] sm:$0xf0]  ;;  %v4719_v58 = vld [vmem:[#allocation5 + $0x3c4] sm:$0xf] }
 0x115   :  { %2488 = vmatmul.bf16.vlgmr.msra.gmra.mxu3 %v4977_v53  ;;  %2471 = vmatpush.bf16.msrb.mxu0 %v4198_v39  ;;  %v1471_v16 = vpop.f32.mrf.mxu1  ;;  %v3934_v35 = vor.u32 %v4642_v25, %v3933_v21  ;;  %v4250_v39 = vor.u32 %v4719_v58, %v4247_v29  ;;  %v3983_v21 = vld [vmem:[#allocation5 + $0x1b8] sm:$0xf0]  ;;  %v4699_v29 = vld [vmem:[#allocation5 + $0x324] sm:$0xf] }
 0x116   :  { %2532 = vmatpush.bf16.msrb.mxu3 %v3886_v34  ;;  %v3965_v34 = vld [vmem:[#allocation5 + $0x188] sm:$0xf]  ;;  %v4002_v16 = vor.u32 %v4656_v10, %v3999_v50  ;;  %v3807_v25 = vld [vmem:[#allocation5 + $0x58] sm:$0xf0]  ;;  %v4151_v10 = vld [vmem:[#allocation5 + $0x310] sm:$0xf0] }
 0x117   :  { %v3966_v4 = vor.u32 %v4650_v61, %v3965_v34  ;;  %v4660_v34 = vld [vmem:[#allocation5 + $0x1ec] sm:$0xf]  ;;  %v4015_v61 = vld [vmem:[#allocation5 + $0x1f8] sm:$0xf0] }
 0x118   :  { %2546 = vmatpush.bf16.msrb.mxu1 %v3998_v43  ;;  %v4991_v2 = vpop.f32.mrf.mxu3  ;;  %v4993_v14 = vpop.f32.mrf.mxu2  ;;  %v4697_v43 = vld [vmem:[#allocation5 + $0x30c] sm:$0xf0]  ;;  %v4018_v3 = vor.u32 %v4660_v34, %v4015_v61  ;;  %v3775_v58 = vld [vmem:[#allocation5 + $0x18] sm:$0xf0]  ;;  %v4640_v61 = vld [vmem:[#allocation5 + $0x14c] sm:$0xf] }
 0x119   :  { %2472 = vmatpush.bf16.msrb.mxu0 %v4182_v13  ;;  %v4150_v45 = vor.u32 %v4697_v43, %v4149_v40  ;;  %v1483_v8 = vadd.f32 %v4991_v2, %v1470_v59  ;;  %v4167_v59 = vld [vmem:[#allocation5 + $0x330] sm:$0xf0]  ;;  %v4636_v50 = vld [vmem:[#allocation5 + $0x12c] sm:$0xf] }
 0x11a   :  { %2533 = vmatpush.bf16.msrb.mxu3 %v3870_v7  ;;  %v4042_v7 = vor.u32 %v4667_v0, %v4039_v1  ;;  %v4616_v0 = vld [vmem:[#allocation5 + $0x8c] sm:$0xf] }
 0x11b   :  { %2501 = vmatmul.bf16.vlgmr.msra.gmra.mxu1 %v4984_v9 }
 0x11c   :  { %2547 = vmatpush.bf16.msrb.mxu1 %v3982_v60  ;;  %2512 = vmatpush.bf16.msra.mxu2 %v4042_v7  ;;  %v4996_v38 = vpop.f32.mrf.mxu0  ;;  %v4620_v60 = vld [vmem:[#allocation5 + $0xac] sm:$0xf]  ;;  %v4231_v7 = vld [vmem:[#allocation5 + $0x3b0] sm:$0xf0] }
 0x11d   :  { %2473 = vmatpush.bf16.msrb.mxu0 %v4166_v28  ;;  %v3858_v63 = vor.u32 %v4620_v60, %v3855_v56  ;;  %v4234_v41 = vor.u32 %v4715_v5, %v4231_v7  ;;  %v4600_v60 = vld [vmem:[#allocation5 + $0xc] sm:$0xf] }
 0x11e   :  { %2534 = vmatpush.bf16.msrb.mxu3 %v3854_v22  ;;  %v4026_v22 = vor.u32 %v4663_v19, %v4023_v57  ;;  %v4215_v19 = vld [vmem:[#allocation5 + $0x390] sm:$0xf0]  ;;  %v1496_v57 = vadd.f32 %v4987_v42, %v1483_v8  ;;  %v4695_v8 = vld [vmem:[#allocation5 + $0x304] sm:$0xf] }
 0x11f   :  { %v4218_v2 = vor.u32 %v4711_v18, %v4215_v19  ;;  %v4632_v19 = vld [vmem:[#allocation5 + $0x10c] sm:$0xf] }
 0x120   :  { %2548 = vmatpush.bf16.msrb.mxu1 %v3966_v4  ;;  %v1484_v37 = vpop.f32.mrf.mxu3  ;;  %2513 = vmatpush.bf16.msra.mxu2 %v4026_v22  ;;  %v1510_v11 = vpop.f32.mrf.mxu2  ;;  %v3839_v4 = vld [vmem:[#allocation5 + $0x98] sm:$0xf0]  ;;  %v1509_v28 = vadd.f32 %v4993_v14, %v1496_v57 }
 0x121   :  { %2474 = vmatpush.bf16.msrb.mxu0 %v4150_v45  ;;  %v3842_v13 = vor.u32 %v4616_v0, %v3839_v4  ;;  %v4604_v37 = vld [vmem:[#allocation5 + $0x2c] sm:$0xf]  ;;  %v4703_v45 = vld [vmem:[#allocation5 + $0x344] sm:$0xf]  ;;  %v3951_v14 = vld [vmem:[#allocation5 + $0x178] sm:$0xf0] }
 0x122   :  { %2535 = vmatpush.bf16.msrb.mxu3 %v3838_v33  ;;  %v3890_v33 = vor.u32 %v4628_v26, %v3887_v27  ;;  %v4707_v26 = vld [vmem:[#allocation5 + $0x364] sm:$0xf]  ;;  %v4199_v27 = vld [vmem:[#allocation5 + $0x370] sm:$0xf0]  ;;  %v3954_v56 = vor.u32 %v4644_v20, %v3951_v14  ;;  %v4690_v4 = vld [vmem:[#allocation5 + $0x2d4] sm:$0xf0] }
 0x123   :  { %v4202_v42 = vor.u32 %v4707_v26, %v4199_v27  ;;  %v3903_v57 = vld [vmem:[#allocation5 + $0x118] sm:$0xf0]  ;;  %v4678_v26 = vld [vmem:[#allocation5 + $0x274] sm:$0xf0]  ;;  %v4692_v14 = vld [vmem:[#allocation5 + $0x2ec] sm:$0xf] }
 0x124   :  { %2549 = vmatpush.bf16.msrb.mxu1 %v3950_v48  ;;  %v1549_v1 = vpop.f32.mrf.mxu0  ;;  %v4652_v48 = vld [vmem:[#allocation5 + $0x1ac] sm:$0xf] }
 0x125   :  { %2519 = vmatpush.bf16.msra.mxu0 %v4266_v49  ;;  %v3986_v24 = vor.u32 %v4652_v48, %v3983_v21  ;;  %v4186_v49 = vor.u32 %v4703_v45, %v4183_v46  ;;  %v4093_v21 = vld [vmem:[#allocation5 + $0x288] sm:$0xf] }
 0x126   :  { %2536 = vmatpush.bf16.msrb.mxu3 %v3822_v51  ;;  %v3918_v51 = vor.u32 %v4638_v32, %v3917_v31  ;;  %v3967_v31 = vld [vmem:[#allocation5 + $0x198] sm:$0xf0] }
 0x128   :  { %2550 = vmatpush.bf16.msrb.mxu1 %v3934_v35 }
 0x129   :  { %2520 = vmatpush.bf16.msra.mxu0 %v4250_v39  ;;  %v3935_v39 = vld [vmem:[#allocation5 + $0x158] sm:$0xf0] }
 0x12a   :  { %2537 = vmatpush.bf16.msrb.mxu3 %v3806_v62  ;;  %v3902_v62 = vor.u32 %v4634_v55, %v3901_v54  ;;  %v4141_v54 = vld [vmem:[#allocation5 + $0x2e8] sm:$0xf]  ;;  %v4694_v55 = vld [vmem:[#allocation5 + $0x2f4] sm:$0xf0]  ;;  %v3938_v5 = vor.u32 %v4640_v61, %v3935_v39 }
 0x12b   :  { %v4142_v0 = vor.u32 %v4694_v55, %v4141_v54  ;;  %v4688_v55 = vld [vmem:[#allocation5 + $0x2cc] sm:$0xf] }
 0x12c   :  { %2551 = vmatpush.bf16.msrb.mxu1 %v3918_v51  ;;  %v1521_v12 = vpop.f32.mrf.mxu1 }
 0x12d   :  { %2521 = vmatpush.bf16.msra.mxu0 %v4234_v41  ;;  %v1522_v35 = vadd.f32 %v1521_v12, %v1509_v28  ;;  %v3919_v41 = vld [vmem:[#allocation5 + $0x138] sm:$0xf0] }
 0x12e   :  { %2538 = vmatpush.bf16.msrb.mxu3 %v3790_v17  ;;  %v3823_v17 = vld [vmem:[#allocation5 + $0x78] sm:$0xf0]  ;;  %v3922_v18 = vor.u32 %v4636_v50, %v3919_v41  ;;  %v4237_v41 = vld [vmem:[#allocation5 + $0x3a8] sm:$0xf] }
 0x12f   :  { %v3826_v22 = vor.u32 %v4612_v15, %v3823_v17  ;;  %v4686_v17 = vld [vmem:[#allocation5 + $0x2b4] sm:$0xf0]  ;;  %v4095_v50 = vld [vmem:[#allocation5 + $0x298] sm:$0xf0] }
 0x130   :  { %2552 = vmatpush.bf16.msrb.mxu1 %v3902_v62  ;;  %v5005_v32 = vpop.f32.mrf.mxu0 }
 0x131   :  { %2522 = vmatpush.bf16.msra.mxu0 %v4218_v2  ;;  %v4682_v2 = vld [vmem:[#allocation5 + $0x294] sm:$0xf0] }
 0x132   :  { %2539 = vmatpush.bf16.msrb.mxu3 %v3774_v30  ;;  %v4648_v30 = vld [vmem:[#allocation5 + $0x18c] sm:$0xf] }
 0x133   :  { %2553 = vmatmul.bf16.vlgmr.msrb.gmra.mxu1 %v4984_v9  ;;  %v3970_v43 = vor.u32 %v4648_v30, %v3967_v31  ;;  %v4061_v31 = vld [vmem:[#allocation5 + $0x248] sm:$0xf] }
 0x134   :  { %2597 = vmatpush.bf16.msra.mxu1 %v4018_v3  ;;  %v1523_v36 = vpop.f32.mrf.mxu1  ;;  %v4125_v3 = vld [vmem:[#allocation5 + $0x2c8] sm:$0xf] }
 0x135   :  { %2540 = vmatmul.bf16.vlgmr.msrb.gmra.mxu3 %v4977_v53  ;;  %2523 = vmatpush.bf16.msra.mxu0 %v4202_v42  ;;  %v4126_v15 = vor.u32 %v4690_v4, %v4125_v3  ;;  %v4670_v36 = vld [vmem:[#allocation5 + $0x234] sm:$0xf0]  ;;  %v4253_v3 = vld [vmem:[#allocation5 + $0x3c8] sm:$0xf] }
 0x136   :  { %2584 = vmatpush.bf16.msra.mxu3 %v3890_v33  ;;  %v3810_v33 = vor.u32 %v4608_v23, %v3807_v25  ;;  %v3906_v23 = vor.u32 %v4632_v19, %v3903_v57  ;;  %v4077_v25 = vld [vmem:[#allocation5 + $0x268] sm:$0xf]  ;;  %v4722_v4 = vld [vmem:[#allocation5 + $0x3d4] sm:$0xf0] }
 0x137   :  { %v4078_v30 = vor.u32 %v4678_v26, %v4077_v25  ;;  %v4714_v19 = vld [vmem:[#allocation5 + $0x394] sm:$0xf0]  ;;  %v4668_v26 = vld [vmem:[#allocation5 + $0x22c] sm:$0xf] }
 0x138   :  { %2598 = vmatpush.bf16.msra.mxu1 %v4002_v16  ;;  %v1534_v40 = vpop.f32.mrf.mxu3  ;;  %v1560_v11 = vpop.f32.mrf.mxu2  ;;  %v4109_v16 = vld [vmem:[#allocation5 + $0x2a8] sm:$0xf] }
 0x139   :  { %v1535_v47 = vadd.f32 %v1534_v40, %v1522_v35  ;;  %v1575_v62 = vpop.f32.mrf.mxu0  ;;  %2524 = vmatpush.bf16.msra.mxu0 %v4186_v49  ;;  %v4110_v48 = vor.u32 %v4686_v17, %v4109_v16  ;;  %v4676_v16 = vld [vmem:[#allocation5 + $0x26c] sm:$0xf]  ;;  %v4079_v17 = vld [vmem:[#allocation5 + $0x278] sm:$0xf0] }
 0x13a   :  { %2585 = vmatpush.bf16.msra.mxu3 %v3874_v52  ;;  %v3794_v52 = vor.u32 %v4604_v37, %v3791_v44  ;;  %v4082_v57 = vor.u32 %v4676_v16, %v4079_v17 }
 0x13b   :  { %v1548_v51 = vadd.f32 %v4996_v38, %v1535_v47  ;;  %v3778_v38 = vor.u32 %v4600_v60, %v3775_v58  ;;  %v4029_v47 = vld [vmem:[#allocation5 + $0x208] sm:$0xf]  ;;  %v4127_v60 = vld [vmem:[#allocation5 + $0x2d8] sm:$0xf0] }
 0x13c   :  { %2599 = vmatpush.bf16.msra.mxu1 %v3986_v24  ;;  %v4094_v24 = vor.u32 %v4682_v2, %v4093_v21  ;;  %v4130_v39 = vor.u32 %v4688_v55, %v4127_v60  ;;  %v4672_v21 = vld [vmem:[#allocation5 + $0x24c] sm:$0xf]  ;;  %v4063_v2 = vld [vmem:[#allocation5 + $0x258] sm:$0xf0]  ;;  %v5026_v60 = vld [vmem:[%s5151_s4] sm:$0xf] }
 0x13d   :  { %v1644_v34 = vmax.f32 %v1548_v51, 0.0  ;;  %v4223_v55 = vld [vmem:[#allocation5 + $0x398] sm:$0xf0] }
 0x13e   :  { %2586 = vmatpush.bf16.msra.mxu3 %v3858_v63  ;;  %v4170_v63 = vor.u32 %v4699_v29, %v4167_v59  ;;  %v4269_v29 = vld [vmem:[#allocation5 + $0x3e8] sm:$0xf]  ;;  %v4726_v59 = vld [vmem:[#allocation5 + $0x3f4] sm:$0xf0] }
 0x13f   :  { %v5008_v1 = vpack.c.bf16 %v1644_v34, %v1644_v34  ;;  %v4270_v62 = vor.u32 %v4726_v59, %v4269_v29  ;;  %v4207_v29 = vld [vmem:[#allocation5 + $0x378] sm:$0xf0] }
 0x140   :  { %2600 = vmatpush.bf16.msra.mxu1 %v3970_v43  ;;  %v1536_v7 = vpop.f32.mrf.mxu3  ;;  %v1562_v12 = vpop.f32.mrf.mxu2  ;;  %2525 = vmatpush.bf16.msra.mxu0 %v4170_v63  ;;  %v4684_v63 = vld [vmem:[#allocation5 + $0x2ac] sm:$0xf] }
 0x141   :  { %2462 = vmatmul.bf16.vlgmr.msrb.gmra.mxu2 %v5008_v1  ;;  %v4718_v12 = vld [vmem:[#allocation5 + $0x3b4] sm:$0xf0] }
 0x142   :  { %2587 = vmatpush.bf16.msra.mxu3 %v3842_v13  ;;  %v4154_v13 = vor.u32 %v4695_v8, %v4151_v10  ;;  %2558 = vmatpush.bf16.msrb.mxu2 %v4142_v0  ;;  %v4111_v0 = vld [vmem:[#allocation5 + $0x2b8] sm:$0xf0]  ;;  %v4254_v8 = vor.u32 %v4722_v4, %v4253_v3  ;;  %v4680_v10 = vld [vmem:[#allocation5 + $0x28c] sm:$0xf] }
 0x143   :  { %v4700_v4 = vld [vmem:[#allocation5 + $0x32c] sm:$0xf] }
 0x144   :  { %2601 = vmatpush.bf16.msra.mxu1 %v3954_v56  ;;  %2526 = vmatpush.bf16.msra.mxu0 %v4154_v13  ;;  %v4098_v13 = vor.u32 %v4680_v10, %v4095_v50  ;;  %v4159_v10 = vld [vmem:[#allocation5 + $0x318] sm:$0xf0] }
 0x146   :  { %2588 = vmatpush.bf16.msra.mxu3 %v3826_v22  ;;  %2559 = vmatpush.bf16.msrb.mxu2 %v4126_v15  ;;  %v265_v22 = vperm.slane %v4957_v6, 3  ;;  %v4238_v15 = vor.u32 %v4718_v12, %v4237_v41 }
 0x148   :  { %2602 = vmatpush.bf16.msra.mxu1 %v3938_v5  ;;  %v1561_v27 = vadd.f32 %v1560_v11, %v265_v22  ;;  %v4143_v11 = vld [vmem:[#allocation5 + $0x2f8] sm:$0xf0]  ;;  %v4114_v5 = vor.u32 %v4684_v63, %v4111_v0  ;;  %v4205_v22 = vld [vmem:[#allocation5 + $0x368] sm:$0xf] }
 0x14a   :  { %2589 = vmatpush.bf16.msra.mxu3 %v3810_v33  ;;  %2560 = vmatpush.bf16.msrb.mxu2 %v4110_v48  ;;  %v1574_v42 = vadd.f32 %v5005_v32, %v1561_v27  ;;  %v4045_v33 = vld [vmem:[#allocation5 + $0x228] sm:$0xf]  ;;  %v4047_v27 = vld [vmem:[#allocation5 + $0x238] sm:$0xf0] }
 0x14b   :  { %v4046_v46 = vor.u32 %v4670_v36, %v4045_v33  ;;  %v4173_v33 = vld [vmem:[#allocation5 + $0x328] sm:$0xf]  ;;  %v4702_v36 = vld [vmem:[#allocation5 + $0x334] sm:$0xf0] }
 0x14c   :  { %2603 = vmatpush.bf16.msra.mxu1 %v3922_v18  ;;  %v1586_v28 = vpop.f32.mrf.mxu1  ;;  %v4221_v18 = vld [vmem:[#allocation5 + $0x388] sm:$0xf] }
 0x14d   :  { %v1587_v37 = vadd.f32 %v1586_v28, %v1574_v42  ;;  %v4222_v48 = vor.u32 %v4714_v19, %v4221_v18  ;;  %v4189_v28 = vld [vmem:[#allocation5 + $0x348] sm:$0xf]  ;;  %v4734_v18 = vld [vmem:[%s5152_s5 + $0x38] sm:$0xff] }
 0x14e   :  { %2590 = vmatpush.bf16.msra.mxu3 %v3794_v52  ;;  %2561 = vmatpush.bf16.msrb.mxu2 %v4094_v24  ;;  %v4146_v52 = vor.u32 %v4692_v14, %v4143_v11  ;;  %v4066_v24 = vor.u32 %v4672_v21, %v4063_v2  ;;  %v4720_v14 = vld [vmem:[#allocation5 + $0x3cc] sm:$0xf]  ;;  %v4255_v11 = vld [vmem:[#allocation5 + $0x3d8] sm:$0xf0] }
 0x150   :  { %2604 = vmatpush.bf16.msra.mxu1 %v3906_v23  ;;  %v1625_v6 = vpop.f32.mrf.mxu0  ;;  %v4710_v23 = vld [vmem:[#allocation5 + $0x374] sm:$0xf0] }
 0x151   :  { %2514 = vmatmul.bf16.vlgmr.msra.gmra.mxu2 %v5008_v1  ;;  %v4206_v25 = vor.u32 %v4710_v23, %v4205_v22  ;;  %v4732_v22 = vld [vmem:[%s5152_s5 + $0x28] sm:$0xff] }
 0x152   :  { %2591 = vmatpush.bf16.msra.mxu3 %v3778_v38  ;;  %2562 = vmatpush.bf16.msrb.mxu2 %v4078_v30  ;;  %v4706_v30 = vld [vmem:[#allocation5 + $0x354] sm:$0xf0] }
 0x153   :  { %2605 = vmatmul.bf16.vlgmr.msra.gmra.mxu1 %v4984_v9  ;;  %v4666_v9 = vld [vmem:[#allocation5 + $0x214] sm:$0xf0]  ;;  %v4190_v42 = vor.u32 %v4706_v30, %v4189_v28  ;;  %v4729_v30 = vld [vmem:[%s5152_s5 + $0x10] sm:$0xff] }
 0x154   :  { %v1588_v40 = vpop.f32.mrf.mxu1  ;;  %v4030_v51 = vor.u32 %v4666_v9, %v4029_v47  ;;  %v4271_v47 = vld [vmem:[#allocation5 + $0x3f8] sm:$0xf0] }
 0x155   :  { %2592 = vmatmul.bf16.vlgmr.msra.gmra.mxu3 %v4977_v53  ;;  %v4674_v53 = vld [vmem:[#allocation5 + $0x254] sm:$0xf0]  ;;  %v4174_v40 = vor.u32 %v4702_v36, %v4173_v33  ;;  %v1783_v36 = vperm.slane %v5026_v60, 3 }
 0x156   :  { %v4062_v35 = vor.u32 %v4674_v53, %v4061_v31  ;;  %v4050_v53 = vor.u32 %v4668_v26, %v4047_v27  ;;  %2904 = vmatpush.bf16.msrb.mxu3 %v4734_v18  ;;  %v4730_v26 = vld [vmem:[%s5152_s5 + $0x18] sm:$0xff] }
 0x157   :  { %v4742_v27 = vld [vmem:[%s5152_s5 + $0x78] sm:$0xff] }
 0x158   :  { %v1599_v43 = vpop.f32.mrf.mxu3  ;;  %v1612_v45 = vpop.f32.mrf.mxu2  ;;  %2563 = vmatpush.bf16.msrb.mxu2 %v4062_v35  ;;  %v4031_v35 = vld [vmem:[#allocation5 + $0x218] sm:$0xf0]  ;;  %2917 = vmatpush.bf16.msrb.mxu1 %v4742_v27 }
 0x159   :  { %v1600_v44 = vadd.f32 %v1599_v43, %v1587_v37  ;;  %v1627_v32 = vpop.f32.mrf.mxu0  ;;  %v4157_v43 = vld [vmem:[#allocation5 + $0x308] sm:$0xf] }
 0x15a   :  { %v4258_v32 = vor.u32 %v4720_v14, %v4255_v11  ;;  %v4736_v14 = vld [vmem:[%s5152_s5 + $0x48] sm:$0xff] }
 0x15b   :  { %v1613_v20 = vadd.f32 %v1612_v45, %v1600_v44  ;;  %v4698_v44 = vld [vmem:[#allocation5 + $0x314] sm:$0xf0]  ;;  %v4748_v11 = vld [vmem:[%s5152_s5 + $0xa8] sm:$0xff] }
 0x15c   :  { %2564 = vmatpush.bf16.msrb.mxu2 %v4046_v46  ;;  %v1638_v54 = vpop.f32.mrf.mxu1  ;;  %v4724_v46 = vld [vmem:[#allocation5 + $0x3ec] sm:$0xf]  ;;  %v4158_v9 = vor.u32 %v4698_v44, %v4157_v43 }
 0x15d   :  { %v1626_v49 = vadd.f32 %v1625_v6, %v1613_v20  ;;  %v4664_v6 = vld [vmem:[#allocation5 + $0x20c] sm:$0xf]  ;;  %v4274_v20 = vor.u32 %v4724_v46, %v4271_v47  ;;  %v4749_v46 = vld [vmem:[%s5152_s5 + $0xb0] sm:$0xff] }
 0x15e   :  { %v4034_v37 = vor.u32 %v4664_v6, %v4031_v35  ;;  %v4727_v6 = vld [vmem:[%s5152_s5] sm:$0xff] }
 0x15f   :  { %v1639_v56 = vadd.f32 %v1638_v54, %v1626_v49  ;;  %v4716_v49 = vld [vmem:[#allocation5 + $0x3ac] sm:$0xf]  ;;  %v4739_v35 = vld [vmem:[%s5152_s5 + $0x60] sm:$0xff] }
 0x160   :  { %v1601_v58 = vpop.f32.mrf.mxu3  ;;  %v1614_v34 = vpop.f32.mrf.mxu2  ;;  %2565 = vmatpush.bf16.msrb.mxu2 %v4030_v51  ;;  %v4239_v51 = vld [vmem:[#allocation5 + $0x3b8] sm:$0xf0]  ;;  %v4712_v54 = vld [vmem:[#allocation5 + $0x38c] sm:$0xf] }
 0x161   :  { %v1645_v61 = vmax.f32 %v1639_v56, 0.0  ;;  %v1780_v56 = vperm.slane %v5026_v60, 0  ;;  %v4708_v58 = vld [vmem:[#allocation5 + $0x36c] sm:$0xf] }
 0x162   :  { %v4210_v59 = vor.u32 %v4708_v58, %v4207_v29  ;;  %v4744_v58 = vld [vmem:[%s5152_s5 + $0x88] sm:$0xff] }
 0x163   :  { %v5016_v38 = vpack.c.bf16 %v1645_v61, %v1645_v61  ;;  %2566 = vmatmul.bf16.vlgmr.msrb.gmra.mxu2 %v5008_v1  ;;  %v4704_v61 = vld [vmem:[#allocation5 + $0x34c] sm:$0xf] }
 0x164   :  { %2610 = vmatpush.bf16.msra.mxu2 %v4146_v52  ;;  %v1640_v7 = vpop.f32.mrf.mxu1  ;;  %v4242_v52 = vor.u32 %v4716_v49, %v4239_v51  ;;  %v4735_v49 = vld [vmem:[%s5152_s5 + $0x40] sm:$0xff] }
 0x165   :  { %2475 = vmatmul.bf16.vlgmr.msrb.gmra.mxu0 %v5016_v38  ;;  %v4747_v51 = vld [vmem:[%s5152_s5 + $0xa0] sm:$0xff] }
 0x166   :  { %2571 = vmatpush.bf16.msrb.mxu0 %v4270_v62 }
 0x168   :  { %2611 = vmatpush.bf16.msra.mxu2 %v4130_v39  ;;  %v4191_v39 = vld [vmem:[#allocation5 + $0x358] sm:$0xf0] }
 0x169   :  { %v4194_v3 = vor.u32 %v4704_v61, %v4191_v39  ;;  %v4743_v61 = vld [vmem:[%s5152_s5 + $0x80] sm:$0xff]  ;;  %v4758_v39 = vld [vmem:[%s5152_s5 + $0xf8] sm:$0xff] }
 0x16a   :  { %2572 = vmatpush.bf16.msrb.mxu0 %v4254_v8  ;;  %v4696_v8 = vld [vmem:[#allocation5 + $0x30c] sm:$0xf] }
 0x16b   :  { %v4162_v12 = vor.u32 %v4696_v8, %v4159_v10 }
 0x16c   :  { %2612 = vmatpush.bf16.msra.mxu2 %v4114_v5  ;;  %v4175_v5 = vld [vmem:[#allocation5 + $0x338] sm:$0xf0] }
 0x16d   :  { %v4178_v7 = vor.u32 %v4700_v4, %v4175_v5  ;;  %v4756_v4 = vld [vmem:[%s5152_s5 + $0xe8] sm:$0xff] }
 0x16e   :  { %2573 = vmatpush.bf16.msrb.mxu0 %v4238_v15 }
 0x170   :  { %2613 = vmatpush.bf16.msra.mxu2 %v4098_v13  ;;  %v1781_v13 = vperm.slane %v5026_v60, 1 }
 0x172   :  { %2574 = vmatpush.bf16.msrb.mxu0 %v4222_v48  ;;  %v4733_v48 = vld [vmem:[%s5152_s5 + $0x30] sm:$0xff] }
 0x173   :  { %2905 = vmatpush.bf16.msrb.mxu3 %v4733_v48 }
 0x174   :  { %2614 = vmatpush.bf16.msra.mxu2 %v4082_v57  ;;  %v1782_v57 = vperm.slane %v5026_v60, 2  ;;  %v4745_v60 = vld [vmem:[%s5152_s5 + $0x90] sm:$0xff] }
 0x175   :  { %2527 = vmatmul.bf16.vlgmr.msra.gmra.mxu0 %v5016_v38 }
 0x176   :  { %2575 = vmatpush.bf16.msrb.mxu0 %v4206_v25 }
 0x177   :  { %2906 = vmatpush.bf16.msrb.mxu3 %v4732_v22 }
 0x178   :  { %v2437_v31 = vpop.f32.mrf.mxu3  ;;  %2615 = vmatpush.bf16.msra.mxu2 %v4066_v24  ;;  %v4731_v24 = vld [vmem:[%s5152_s5 + $0x20] sm:$0xff] }
 0x179   :  { %v2438_v34 = vadd.f32 %v2437_v31, %v1780_v56  ;;  %v4741_v31 = vld [vmem:[%s5152_s5 + $0x70] sm:$0xff] }
 0x17a   :  { %2576 = vmatpush.bf16.msrb.mxu0 %v4190_v42  ;;  %2918 = vmatpush.bf16.msrb.mxu1 %v4741_v31  ;;  %v4740_v42 = vld [vmem:[%s5152_s5 + $0x68] sm:$0xff] }
 0x17b   :  { %2907 = vmatpush.bf16.msrb.mxu3 %v4731_v24 }
 0x17c   :  { %2616 = vmatpush.bf16.msra.mxu2 %v4050_v53  ;;  %v4728_v53 = vld [vmem:[%s5152_s5 + $0x8] sm:$0xff] }
 0x17e   :  { %2577 = vmatpush.bf16.msrb.mxu0 %v4174_v40  ;;  %2919 = vmatpush.bf16.msrb.mxu1 %v4740_v42  ;;  %v4750_v40 = vld [vmem:[%s5152_s5 + $0xb8] sm:$0xff] }
 0x17f   :  { %2908 = vmatpush.bf16.msrb.mxu3 %v4730_v26 }
 0x180   :  { %v2439_v45 = vpop.f32.mrf.mxu3  ;;  %2617 = vmatpush.bf16.msra.mxu2 %v4034_v37  ;;  %v4738_v37 = vld [vmem:[%s5152_s5 + $0x58] sm:$0xff] }
 0x181   :  { %v4737_v45 = vld [vmem:[%s5152_s5 + $0x50] sm:$0xff] }
 0x182   :  { %2578 = vmatpush.bf16.msrb.mxu0 %v4158_v9  ;;  %2920 = vmatpush.bf16.msrb.mxu1 %v4739_v35 }
 0x183   :  { %2618 = vmatmul.bf16.vlgmr.msra.gmra.mxu2 %v5008_v1  ;;  %v4226_v1 = vor.u32 %v4712_v54, %v4223_v55  ;;  %2909 = vmatpush.bf16.msrb.mxu3 %v4729_v30  ;;  %v4746_v55 = vld [vmem:[%s5152_s5 + $0x98] sm:$0xff] }
 0x184   :  { %2930 = vmatpush.bf16.msrb.mxu2 %v4750_v40 }
 0x185   :  { %2579 = vmatmul.bf16.vlgmr.msrb.gmra.mxu0 %v5016_v38 }
 0x186   :  { %2623 = vmatpush.bf16.msra.mxu0 %v4274_v20  ;;  %2921 = vmatpush.bf16.msrb.mxu1 %v4738_v37 }
 0x187   :  { %2910 = vmatpush.bf16.msrb.mxu3 %v4728_v53 }
 0x188   :  { %v2450_v62 = vpop.f32.mrf.mxu1  ;;  %2931 = vmatpush.bf16.msrb.mxu2 %v4749_v46 }
 0x189   :  { %v5029_v0 = vadd.f32 %v2450_v62, %v2438_v34 }
 0x18a   :  { %2624 = vmatpush.bf16.msra.mxu0 %v4258_v32  ;;  %2922 = vmatpush.bf16.msrb.mxu1 %v4737_v45 }
 0x18b   :  { %2911 = vmatpush.bf16.msrb.mxu3 %v4727_v6 }
 0x18c   :  { %2932 = vmatpush.bf16.msrb.mxu2 %v4748_v11 }
 0x18e   :  { %2625 = vmatpush.bf16.msra.mxu0 %v4242_v52  ;;  %2923 = vmatpush.bf16.msrb.mxu1 %v4736_v14 }
 0x190   :  { %v2452_v50 = vpop.f32.mrf.mxu1  ;;  %2933 = vmatpush.bf16.msrb.mxu2 %v4747_v51 }
 0x192   :  { %2626 = vmatpush.bf16.msra.mxu0 %v4226_v1  ;;  %2924 = vmatpush.bf16.msrb.mxu1 %v4735_v49 }
 0x194   :  { %2934 = vmatpush.bf16.msrb.mxu2 %v4746_v55 }
 0x196   :  { %2627 = vmatpush.bf16.msra.mxu0 %v4210_v59 }
 0x198   :  { %v2489_v63 = vpop.f32.mrf.mxu3  ;;  %v2502_v16 = vpop.f32.mrf.mxu1  ;;  %2935 = vmatpush.bf16.msrb.mxu2 %v4745_v60 }
 0x199   :  { %v2490_v15 = vadd.f32 %v2489_v63, %v1781_v13 }
 0x19a   :  { %2628 = vmatpush.bf16.msra.mxu0 %v4194_v3 }
 0x19b   :  { %v5032_v17 = vadd.f32 %v2502_v16, %v2490_v15  ;;  %v4753_v15 = vld [vmem:[%s5152_s5 + $0xd0] sm:$0xff] }
 0x19c   :  { %2936 = vmatpush.bf16.msrb.mxu2 %v4744_v58 }
 0x19e   :  { %2629 = vmatpush.bf16.msra.mxu0 %v4178_v7  ;;  %v4755_v7 = vld [vmem:[%s5152_s5 + $0xe0] sm:$0xff] }
 0x1a0   :  { %v2491_v41 = vpop.f32.mrf.mxu3  ;;  %v2504_v19 = vpop.f32.mrf.mxu1  ;;  %2937 = vmatpush.bf16.msrb.mxu2 %v4743_v61 }
 0x1a1   :  { %v4754_v41 = vld [vmem:[%s5152_s5 + $0xd8] sm:$0xff]  ;;  %v4751_v19 = vld [vmem:[%s5152_s5 + $0xc0] sm:$0xff] }
 0x1a2   :  { %2630 = vmatpush.bf16.msra.mxu0 %v4162_v12 }
 0x1a5   :  { %2631 = vmatmul.bf16.vlgmr.msra.gmra.mxu0 %v5016_v38 }
 0x1a6   :  { %2943 = vmatpush.bf16.msrb.mxu0 %v4758_v39 }
 0x1b0   :  { %v2554_v38 = vpop.f32.mrf.mxu1 }
 0x1b8   :  { %v2541_v21 = vpop.f32.mrf.mxu3  ;;  %v2556_v28 = vpop.f32.mrf.mxu1 }
 0x1b9   :  { %v2542_v2 = vadd.f32 %v2541_v21, %v1782_v57 }
 0x1bb   :  { %v5045_v23 = vadd.f32 %v2554_v38, %v2542_v2 }
 0x1c0   :  { %v2543_v25 = vpop.f32.mrf.mxu3 }
 0x1c4   :  { %v2463_v33 = vpop.f32.mrf.mxu2 }
 0x1c5   :  { %v2464_v56 = vadd.f32 %v2463_v33, %v5029_v0  ;;  %v4757_v0 = vld [vmem:[%s5152_s5 + $0xf0] sm:$0xff] }
 0x1c6   :  { %2944 = vmatpush.bf16.msrb.mxu0 %v4757_v0 }
 0x1ca   :  { %2945 = vmatpush.bf16.msrb.mxu0 %v4756_v4 }
 0x1cc   :  { %v2465_v9 = vpop.f32.mrf.mxu2 }
 0x1ce   :  { %2946 = vmatpush.bf16.msrb.mxu0 %v4755_v7 }
 0x1d0   :  { %v2606_v47 = vpop.f32.mrf.mxu1 }
 0x1d2   :  { %2947 = vmatpush.bf16.msrb.mxu0 %v4754_v41 }
 0x1d4   :  { %v2515_v54 = vpop.f32.mrf.mxu2 }
 0x1d5   :  { %v2516_v8 = vadd.f32 %v2515_v54, %v5032_v17  ;;  %v4752_v17 = vld [vmem:[%s5152_s5 + $0xc8] sm:$0xff] }
 0x1d6   :  { %2948 = vmatpush.bf16.msrb.mxu0 %v4753_v15 }
 0x1d8   :  { %v2593_v43 = vpop.f32.mrf.mxu3  ;;  %v2608_v52 = vpop.f32.mrf.mxu1 }
 0x1d9   :  { %v2594_v44 = vadd.f32 %v2593_v43, %v1783_v36  ;;  %v4764_v36 = vld [vmem:[%s5153_s6] ss:$0 sm:$0xff] }
 0x1da   :  { %2949 = vmatpush.bf16.msrb.mxu0 %v4752_v17 }
 0x1db   :  { %v5087_v20 = vadd.f32 %v2606_v47, %v2594_v44 }
 0x1dc   :  { %v2517_v1 = vpop.f32.mrf.mxu2 }
 0x1de   :  { %2950 = vmatpush.bf16.msrb.mxu0 %v4751_v19 }
 0x1e0   :  { %v2595_v32 = vpop.f32.mrf.mxu3 }
 0x1e2   :  { %v2476_v29 = vpop.f32.mrf.mxu0 }
 0x1e3   :  { %v2477_v59 = vadd.f32 %v2476_v29, %v2464_v56 }
 0x1e5   :  { %v2636_v34 = vmax.f32 %v2477_v59, 0.0 }
 0x1e6   :  { %v2567_v62 = vpop.f32.mrf.mxu2 }
 0x1e7   :  { %v2640_v63 = vpack.c.bf16 %v2636_v34, %v2636_v34  ;;  %v2568_v18 = vadd.f32 %v2567_v62, %v5045_v23 }
 0x1e9   :  { %2912 = vmatmul.bf16.vlgmr.msrb.gmra.mxu3 %v2640_v63 }
 0x1ea   :  { %v2478_v3 = vpop.f32.mrf.mxu0 }
 0x1ee   :  { %v2569_v5 = vpop.f32.mrf.mxu2 }
 0x1f2   :  { %v2528_v10 = vpop.f32.mrf.mxu0 }
 0x1f3   :  { %v2529_v50 = vadd.f32 %v2528_v10, %v2516_v8 }
 0x1f5   :  { %v2637_v12 = vmax.f32 %v2529_v50, 0.0 }
 0x1f7   :  { %v2641_v13 = vpack.c.bf16 %v2637_v12, %v2637_v12 }
 0x1f9   :  { %2925 = vmatmul.bf16.vlgmr.msrb.gmra.mxu1 %v2641_v13 }
 0x1fa   :  { %v2530_v16 = vpop.f32.mrf.mxu0 }
 0x202   :  { %v2580_v57 = vpop.f32.mrf.mxu0 }
 0x203   :  { %v2581_v48 = vadd.f32 %v2580_v57, %v2568_v18 }
 0x205   :  { %v2638_v2 = vmax.f32 %v2581_v48, 0.0 }
 0x206   :  { %v2619_v21 = vpop.f32.mrf.mxu2 }
 0x207   :  { %v2642_v22 = vpack.c.bf16 %v2638_v2, %v2638_v2  ;;  %v2620_v25 = vadd.f32 %v2619_v21, %v5087_v20 }
 0x209   :  { %2938 = vmatmul.bf16.vlgmr.msrb.gmra.mxu2 %v2642_v22 }
 0x20a   :  { %v2582_v38 = vpop.f32.mrf.mxu0 }
 0x20e   :  { %v2621_v24 = vpop.f32.mrf.mxu2 }
 0x222   :  { %v2632_v26 = vpop.f32.mrf.mxu0 }
 0x223   :  { %v2633_v27 = vadd.f32 %v2632_v26, %v2620_v25 }
 0x225   :  { %v2639_v28 = vmax.f32 %v2633_v27, 0.0 }
 0x227   :  { %v2643_v30 = vpack.c.bf16 %v2639_v28, %v2639_v28 }
 0x229   :  { %2951 = vmatmul.bf16.vlgmr.msrb.gmra.mxu0 %v2643_v30 }
 0x22a   :  { %v2634_v23 = vpop.f32.mrf.mxu0 }
 0x26c   :  { %v2913_v31 = vpop.f32.mrf.mxu3 }
 0x26d   :  { %v2914_v37 = vadd.f32 %v4764_v36, %v2913_v31 }
 0x274   :  { %v2915_v53 = vpop.f32.mrf.mxu3 }
 0x276   :  { %v2926_v42 = vpop.f32.mrf.mxu1 }
 0x277   :  { %v2927_v40 = vadd.f32 %v2926_v42, %v2914_v37 }
 0x27e   :  { %v2928_v6 = vpop.f32.mrf.mxu1 }
 0x28c   :  { %v2939_v35 = vpop.f32.mrf.mxu2 }
 0x28d   :  { %v2940_v43 = vadd.f32 %v2939_v35, %v2927_v40 }
 0x294   :  { %v2941_v33 = vpop.f32.mrf.mxu2 }
 0x2a6   :  { %v2952_v44 = vpop.f32.mrf.mxu0 }
 0x2a7   :  { %v2953_v45 = vadd.f32 %v2952_v44, %v2940_v43 }
 0x2a9   :  { %2956 = vst [vmem:[#allocation7] sm:$0xff] %v2953_v45 }
 0x2aa   :  { %2967 = dma.vmem_to_hbm [thread:$0]  %s2963_s30, 128, %s2965_s10, [#allocation4]  }
 0x2ae   :  { %v2954_v46 = vpop.f32.mrf.mxu0 }
 0x2af   :  { %4841 = dma.done.wait [#allocation4], 128  }
 0x2b0   :  { %4842 = vsyncadd [#allocation4], 4294967168 }
 0x2b1   :  { %2972 = vsyncpa [#allocation3], 1 }
 0x2b2   :  { %2973 = vsyncpa [#allocation6], 1 }
 0x2b3   :  { %2974 = vsyncpa [#allocation4], 1 }

</bundles_post_ra>
